<compile_context>
chip_gen: v7x
topology: tpu7x:2x2x1
jax: 0.10.0
libtpu: 0.0.40
codegen_flags: <defaults>
</compile_context>

<pallas_src>
import jax
import jax.numpy as jnp
from jax import lax
from jax.experimental import pallas as pl
from jax.experimental.pallas import tpu as pltpu

LANE = 128


def _round_up(n, m=LANE):
  return ((n + m - 1) // m) * m


def _pad_last(x, target):
  pad = target - x.shape[-1]
  if pad <= 0:
    return x
  return jnp.pad(x, [(0, 0)] * (x.ndim - 1) + [(0, pad)])


# ----------------------------- fused Pallas kernel ---------------------------

def _fused_forward_kernel(
    pxT_ref, sxT_ref,              # node features^T (din, Np_pad/Ns_pad)  bf16
    pwT_ref, swT_ref,              # encoder Linear W^T (h, din)           bf16
    pembT_ref, sembT_ref,          # embedding^T + encoder bias (h, N_pad) f32
    adjT_ps_ref, adjT_sp_ref,      # mean-normalized adjacency^T (padded)  bf16
    convw_ref,                     # (8, h, h) bf16: [Wl,Wr]^T per conv
    convb_ref,                     # (4, h, 1)  f32: lin_l bias per conv
    eip_ref, eis_ref,              # labeled edge endpoints (1, E_pad)     int32
    pred_ref,                      # output (1, E_pad)                     f32
):
  f32, bf16 = jnp.float32, jnp.bfloat16

  def sage(adjT_ref, x_src_bf, x_dst_bf, idx, relu):
    # mean aggregation over neighbours: agg^T = x_src^T @ adj^T   (MXU)
    aggT = jnp.dot(x_src_bf, adjT_ref[...], preferred_element_type=f32)
    # split [Wl|Wr] matmul: no concat copy; both dots accumulate in f32.
    outT = (jnp.dot(convw_ref[2 * idx], aggT.astype(bf16),
                    preferred_element_type=f32)
            + jnp.dot(convw_ref[2 * idx + 1], x_dst_bf,
                      preferred_element_type=f32)
            + convb_ref[idx])
    return jnp.maximum(outT, 0.0) if relu else outT

  # --- encoders: Linear(x) + (Embedding(node_id) + bias) (fused) ---
  x_pT = jnp.dot(pwT_ref[...], pxT_ref[...],
                 preferred_element_type=f32) + pembT_ref[...]
  x_sT = jnp.dot(swT_ref[...], sxT_ref[...],
                 preferred_element_type=f32) + sembT_ref[...]
  x_pT_bf = x_pT.astype(bf16)     # each activation cast to bf16 exactly once
  x_sT_bf = x_sT.astype(bf16)

  # --- hetero GNN: 2 SAGE layers per edge type, ReLU in between ---
  x_s1_bf = sage(adjT_ps_ref, x_pT_bf, x_sT_bf, 0, True).astype(bf16)
  x_p1_bf = sage(adjT_sp_ref, x_sT_bf, x_pT_bf, 1, True).astype(bf16)
  x_s2_bf = sage(adjT_ps_ref, x_p1_bf, x_s1_bf, 2, False).astype(bf16)
  x_p2_bf = sage(adjT_sp_ref, x_s1_bf, x_p1_bf, 3, False).astype(bf16)

  # --- classifier: one-hot gather of endpoint columns, then per-edge dot ---
  # (nodes and edges both padded to full 128-lane width; padded edges point at
  #  node 0 and are sliced off in the wrapper)
  num_p = x_p2_bf.shape[1]
  num_s = x_s2_bf.shape[1]
  E = eip_ref.shape[1]
  sel_p = (lax.broadcasted_iota(jnp.int32, (num_p, E), 0)
           == eip_ref[...]).astype(bf16)                       # (Np_pad, E_pad)
  sel_s = (lax.broadcasted_iota(jnp.int32, (num_s, E), 0)
           == eis_ref[...]).astype(bf16)                       # (Ns_pad, E_pad)
  feat_pT = jnp.dot(x_p2_bf, sel_p, preferred_element_type=f32)
  feat_sT = jnp.dot(x_s2_bf, sel_s, preferred_element_type=f32)
  # lane-dense (1, E_pad) output: edge dimension on lanes, sublane reduction.
  pred_ref[...] = jnp.sum(feat_pT * feat_sT, axis=0, keepdims=True)


def fused_forward(args, e_pad):
  vmem = pl.BlockSpec(memory_space=pltpu.MemorySpace.VMEM)
  return pl.pallas_call(
      _fused_forward_kernel,
      out_shape=jax.ShapeDtypeStruct((1, e_pad), jnp.float32),
      in_specs=[vmem] * len(args),
      out_specs=vmem,
      # No grid: whole padded problem (< 1 MiB) lives in VMEM.  At scale: grid
      # dst tiles "parallel" + src-K "arbitrary", f32 VMEM accumulators, tile
      # sizes 128 (v5e) / 256 (v6e, v7x with half the tile area for 64 MiB VMEM),
      # and explicit CompilerParams(vmem_limit_bytes=...).
  )(*args)


# ------------------------------ parameter init -------------------------------

def _init_linear_T(key, din, dout):
  """Returns (W^T bf16 of shape (dout, din), bias f32 of shape (dout, 1))."""
  k1, k2 = jax.random.split(key)
  bound = 1.0 / jnp.sqrt(jnp.float32(din))
  w = jax.random.uniform(k1, (din, dout), jnp.float32, -bound, bound)
  b = jax.random.uniform(k2, (dout,), jnp.float32, -bound, bound)
  return w.T.astype(jnp.bfloat16), b.reshape(dout, 1)


def init_params(num_pdrugs, num_seffect, pdrugs_size, hidden):
  keys = jax.random.split(jax.random.PRNGKey(42), 12)
  p = {"hidden": hidden}
  p["seffect_lin_wT"], p["seffect_lin_b"] = _init_linear_T(keys[0], 768, hidden)
  p["pdrugs_lin_wT"], p["pdrugs_lin_b"] = _init_linear_T(keys[1], pdrugs_size, hidden)
  p["pdrugs_embT"] = jax.random.normal(keys[2], (hidden, num_pdrugs), jnp.float32)
  p["seffect_embT"] = jax.random.normal(keys[3], (hidden, num_seffect), jnp.float32)
  # 4 SAGEConvs (conv1 ps, conv1 sp, conv2 ps, conv2 sp); each has
  # lin_l (neighbours, with bias) and lin_r (root, no bias).
  # Stacked ONCE at init into single arrays -> 2 kernel operands instead of 8.
  w_list, b_list = [], []
  for i in range(4):
    wlT, bl = _init_linear_T(keys[4 + 2 * i], hidden, hidden)
    wrT, _ = _init_linear_T(keys[5 + 2 * i], hidden, hidden)
    w_list.extend([wlT, wrT])
    b_list.append(bl)
  p["conv_wT"] = jnp.stack(w_list)       # (8, h, h) bf16  [l,r, l,r, ...]
  p["conv_b"] = jnp.stack(b_list)        # (4, h, 1) f32
  return p


# --------------------------- per-graph preprocessing --------------------------

def mean_adjacency_T(edge_index, num_src, num_dst, src_pad, dst_pad):
  """Transposed row-mean-normalized dense adjacency, zero-padded to full lane
  width: [src_pad, dst_pad] bf16.  Degree normalization is done in f32."""
  src, dst = edge_index[0], edge_index[1]
  adj = jnp.zeros((num_dst, num_src), jnp.float32).at[dst, src].add(1.0)
  deg = jnp.clip(adj.sum(axis=1, keepdims=True), 1.0, None)
  adj = adj / deg
  adj = jnp.pad(adj, ((0, dst_pad - num_dst), (0, src_pad - num_src)))
  # TODO(synk): bf16 adjacency stores 1/deg with ~2^-8 relative error; keep f32
  # if bit-closeness to the f32 PyTorch model matters more than MXU rate.
  return adj.T.astype(jnp.bfloat16)


def prepare_graph(data):
  """One-time per-graph prep (hoisted out of the forward): dense normalized
  adjacencies (bf16, transposed, lane-padded) and bf16 feature-major node
  features padded to a multiple of 128 nodes."""
  d = dict(data)
  num_p, num_s = data["num_pdrugs"], data["num_seffect"]
  np_pad, ns_pad = _round_up(num_p), _round_up(num_s)
  d["np_pad"], d["ns_pad"] = np_pad, ns_pad
  edge_ps = data["edge_index"]                      # pdrugs -> seffect
  edge_sp = jnp.stack([edge_ps[1], edge_ps[0]])     # reverse edge type
  d["adjT_ps"] = mean_adjacency_T(edge_ps, num_p, num_s, np_pad, ns_pad)
  d["adjT_sp"] = mean_adjacency_T(edge_sp, num_s, num_p, ns_pad, np_pad)
  d["pdrugs_xT"] = _pad_last(data["pdrugs_x"].T.astype(jnp.bfloat16), np_pad)
  d["seffect_xT"] = _pad_last(data["seffect_x"].T.astype(jnp.bfloat16), ns_pad)
  return d


# --------------------------------- forward ------------------------------------

def model_forward(params, data, is_neg_sampling=True):
  num_p, num_s = data["num_pdrugs"], data["num_seffect"]
  if "adjT_ps" not in data:          # normally hoisted via prepare_graph(...)
    data = prepare_graph(data)
  np_pad, ns_pad = data["np_pad"], data["ns_pad"]

  # Embedding-row gather (node_id indexing) with the encoder Linear bias
  # pre-added (removes two kernel operands); padded node columns stay zero.
  pembT = _pad_last(params["pdrugs_embT"][:, data["pdrugs_node_id"]]
                    + params["pdrugs_lin_b"], np_pad)
  sembT = _pad_last(params["seffect_embT"][:, data["seffect_node_id"]]
                    + params["seffect_lin_b"], ns_pad)

  if is_neg_sampling:
    num_neg = data["edge_label_index"].shape[1]
    # Mirrors the module's torch.manual_seed(42) before negative_sampling.
    # TODO(synk): torch_geometric.negative_sampling(force_undirected=True)
    # de-duplicates against existing edges; plain uniform random pairs are
    # drawn here instead.
    k1, k2 = jax.random.split(jax.random.PRNGKey(42))
    neg = jnp.stack([jax.random.randint(k1, (num_neg,), 0, num_p),
                     jax.random.randint(k2, (num_neg,), 0, num_s)])
    edge_label_index = jnp.concatenate([data["edge_label_index"], neg], axis=-1)
    edge_label = jnp.concatenate(
        [data["edge_label"],
         jnp.zeros((num_neg,), data["edge_label"].dtype)], axis=0)
  else:
    edge_label_index = data["edge_label_index"]
    edge_label = data["edge_label"]

  # Pad the edge dimension to 128 lanes (dummy edges point at node 0, results
  # sliced off below) -> unmasked full-width stores and full MXU columns.
  E = edge_label_index.shape[1]
  e_pad = _round_up(E)
  eip = _pad_last(edge_label_index[0].astype(jnp.int32).reshape(1, E), e_pad)
  eis = _pad_last(edge_label_index[1].astype(jnp.int32).reshape(1, E), e_pad)

  args = (
      data["pdrugs_xT"], data["seffect_xT"],
      params["pdrugs_lin_wT"], params["seffect_lin_wT"],
      pembT, sembT,
      data["adjT_ps"], data["adjT_sp"],
      params["conv_wT"], params["conv_b"],
      eip, eis,
  )
  pred = fused_forward(args, e_pad)[0, :E]
  return pred, edge_label


# --------------------------------- main ----------------------------------------

if __name__ == "__main__":
  num_pdrugs, num_seffect = 16, 16
  pdrugs_size, hidden = 32, 32
  num_edges, num_pos = 48, 8

  key = jax.random.PRNGKey(0)
  k_px, k_sx, k_esrc, k_edst = jax.random.split(key, 4)

  edge_index = jnp.stack([
      jax.random.randint(k_esrc, (num_edges,), 0, num_pdrugs),
      jax.random.randint(k_edst, (num_edges,), 0, num_seffect),
  ])

  data = {
      "num_pdrugs": num_pdrugs,
      "num_seffect": num_seffect,
      "pdrugs_x": jax.random.normal(k_px, (num_pdrugs, pdrugs_size), jnp.float32),
      "seffect_x": jax.random.normal(k_sx, (num_seffect, 768), jnp.float32),
      "pdrugs_node_id": jnp.arange(num_pdrugs, dtype=jnp.int32),
      "seffect_node_id": jnp.arange(num_seffect, dtype=jnp.int32),
      "edge_index": edge_index,
      "edge_label_index": edge_index[:, :num_pos],
      "edge_label": jnp.ones((num_pos,), jnp.float32),
  }
  data = prepare_graph(data)          # adjacency + padding built once per graph

  params = init_params(num_pdrugs, num_seffect, pdrugs_size, hidden)

  pred, edge_label = model_forward(params, data, is_neg_sampling=True)
  jax.block_until_ready((pred, edge_label))

  assert pred.shape == (2 * num_pos,)
  assert edge_label.shape == (2 * num_pos,)
  assert bool(jnp.all(jnp.isfinite(pred)))
  print("KERNEL_OK")
</pallas_src>

<mosaic_0001>
module attributes {stable_mosaic.version = 11 : i64} {
  func.func @_fused_forward_kernel(%arg0: memref<32x128xbf16, #tpu.memory_space<vmem>>, %arg1: memref<768x128xbf16, #tpu.memory_space<vmem>>, %arg2: memref<32x32xbf16, #tpu.memory_space<vmem>>, %arg3: memref<32x768xbf16, #tpu.memory_space<vmem>>, %arg4: memref<32x128xf32, #tpu.memory_space<vmem>>, %arg5: memref<32x128xf32, #tpu.memory_space<vmem>>, %arg6: memref<128x128xbf16, #tpu.memory_space<vmem>>, %arg7: memref<128x128xbf16, #tpu.memory_space<vmem>>, %arg8: memref<8x32x32xbf16, #tpu.memory_space<vmem>>, %arg9: memref<4x32x1xf32, #tpu.memory_space<vmem>>, %arg10: memref<1x128xi32, #tpu.memory_space<vmem>>, %arg11: memref<1x128xi32, #tpu.memory_space<vmem>>, %arg12: memref<1x128xf32, #tpu.memory_space<vmem>>) attributes {dimension_semantics = [], scalar_prefetch = 0 : i64, scratch_operands = 0 : i64, tpu.core_type = #tpu.core_type<tc>} {
    %c0 = arith.constant 0 : index
    %c0_0 = arith.constant 0 : index
    %0 = vector.load %arg2[%c0, %c0_0] : memref<32x32xbf16, #tpu.memory_space<vmem>>, vector<32x32xbf16>
    %c0_1 = arith.constant 0 : index
    %c0_2 = arith.constant 0 : index
    %1 = vector.load %arg0[%c0_1, %c0_2] : memref<32x128xbf16, #tpu.memory_space<vmem>>, vector<32x128xbf16>
    %cst = arith.constant dense<0.000000e+00> : vector<32x128xf32>
    %2 = tpu.matmul %0, %1, %cst {dimension_numbers = #tpu.dot_dimension_numbers<[1], [0], [0], [1], [0, 0, 1, 1], [], []>} : vector<32x32xbf16>, vector<32x128xbf16>, vector<32x128xf32> -> vector<32x128xf32>
    %c0_3 = arith.constant 0 : index
    %c0_4 = arith.constant 0 : index
    %3 = vector.load %arg4[%c0_3, %c0_4] : memref<32x128xf32, #tpu.memory_space<vmem>>, vector<32x128xf32>
    %4 = arith.addf %2, %3 : vector<32x128xf32>
    %c0_5 = arith.constant 0 : index
    %c0_6 = arith.constant 0 : index
    %5 = vector.load %arg3[%c0_5, %c0_6] : memref<32x768xbf16, #tpu.memory_space<vmem>>, vector<32x768xbf16>
    %c0_7 = arith.constant 0 : index
    %c0_8 = arith.constant 0 : index
    %6 = vector.load %arg1[%c0_7, %c0_8] : memref<768x128xbf16, #tpu.memory_space<vmem>>, vector<768x128xbf16>
    %cst_9 = arith.constant dense<0.000000e+00> : vector<32x128xf32>
    %7 = tpu.matmul %5, %6, %cst_9 {dimension_numbers = #tpu.dot_dimension_numbers<[1], [0], [0], [1], [0, 0, 1, 1], [], []>} : vector<32x768xbf16>, vector<768x128xbf16>, vector<32x128xf32> -> vector<32x128xf32>
    %c0_10 = arith.constant 0 : index
    %c0_11 = arith.constant 0 : index
    %8 = vector.load %arg5[%c0_10, %c0_11] : memref<32x128xf32, #tpu.memory_space<vmem>>, vector<32x128xf32>
    %9 = arith.addf %7, %8 : vector<32x128xf32>
    %10 = arith.truncf %4 : vector<32x128xf32> to vector<32x128xbf16>
    %11 = arith.truncf %9 : vector<32x128xf32> to vector<32x128xbf16>
    %c0_12 = arith.constant 0 : index
    %c0_13 = arith.constant 0 : index
    %12 = vector.load %arg6[%c0_12, %c0_13] : memref<128x128xbf16, #tpu.memory_space<vmem>>, vector<128x128xbf16>
    %cst_14 = arith.constant dense<0.000000e+00> : vector<32x128xf32>
    %13 = tpu.matmul %10, %12, %cst_14 {dimension_numbers = #tpu.dot_dimension_numbers<[1], [0], [0], [1], [0, 0, 1, 1], [], []>} : vector<32x128xbf16>, vector<128x128xbf16>, vector<32x128xf32> -> vector<32x128xf32>
    %c0_15 = arith.constant 0 : index
    %c0_16 = arith.constant 0 : index
    %c0_17 = arith.constant 0 : index
    %14 = vector.load %arg8[%c0_15, %c0_16, %c0_17] : memref<8x32x32xbf16, #tpu.memory_space<vmem>>, vector<1x32x32xbf16>
    %15 = vector.shape_cast %14 : vector<1x32x32xbf16> to vector<32x32xbf16>
    %16 = arith.truncf %13 : vector<32x128xf32> to vector<32x128xbf16>
    %cst_18 = arith.constant dense<0.000000e+00> : vector<32x128xf32>
    %17 = tpu.matmul %15, %16, %cst_18 {dimension_numbers = #tpu.dot_dimension_numbers<[1], [0], [0], [1], [0, 0, 1, 1], [], []>} : vector<32x32xbf16>, vector<32x128xbf16>, vector<32x128xf32> -> vector<32x128xf32>
    %c1 = arith.constant 1 : index
    %c0_19 = arith.constant 0 : index
    %c0_20 = arith.constant 0 : index
    %18 = vector.load %arg8[%c1, %c0_19, %c0_20] : memref<8x32x32xbf16, #tpu.memory_space<vmem>>, vector<1x32x32xbf16>
    %19 = vector.shape_cast %18 : vector<1x32x32xbf16> to vector<32x32xbf16>
    %cst_21 = arith.constant dense<0.000000e+00> : vector<32x128xf32>
    %20 = tpu.matmul %19, %11, %cst_21 {dimension_numbers = #tpu.dot_dimension_numbers<[1], [0], [0], [1], [0, 0, 1, 1], [], []>} : vector<32x32xbf16>, vector<32x128xbf16>, vector<32x128xf32> -> vector<32x128xf32>
    %21 = arith.addf %17, %20 : vector<32x128xf32>
    %c0_22 = arith.constant 0 : index
    %c0_23 = arith.constant 0 : index
    %c0_24 = arith.constant 0 : index
    %22 = vector.load %arg9[%c0_22, %c0_23, %c0_24] : memref<4x32x1xf32, #tpu.memory_space<vmem>>, vector<1x32x1xf32>
    %23 = vector.shape_cast %22 : vector<1x32x1xf32> to vector<32x1xf32>
    %24 = vector.broadcast %23 : vector<32x1xf32> to vector<32x128xf32>
    %25 = arith.addf %21, %24 : vector<32x128xf32>
    %cst_25 = arith.constant 0.000000e+00 : f32
    %26 = vector.broadcast %cst_25 : f32 to vector<32x128xf32>
    %27 = arith.maximumf %25, %26 : vector<32x128xf32>
    %28 = arith.truncf %27 : vector<32x128xf32> to vector<32x128xbf16>
    %c0_26 = arith.constant 0 : index
    %c0_27 = arith.constant 0 : index
    %29 = vector.load %arg7[%c0_26, %c0_27] : memref<128x128xbf16, #tpu.memory_space<vmem>>, vector<128x128xbf16>
    %cst_28 = arith.constant dense<0.000000e+00> : vector<32x128xf32>
    %30 = tpu.matmul %11, %29, %cst_28 {dimension_numbers = #tpu.dot_dimension_numbers<[1], [0], [0], [1], [0, 0, 1, 1], [], []>} : vector<32x128xbf16>, vector<128x128xbf16>, vector<32x128xf32> -> vector<32x128xf32>
    %c2 = arith.constant 2 : index
    %c0_29 = arith.constant 0 : index
    %c0_30 = arith.constant 0 : index
    %31 = vector.load %arg8[%c2, %c0_29, %c0_30] : memref<8x32x32xbf16, #tpu.memory_space<vmem>>, vector<1x32x32xbf16>
    %32 = vector.shape_cast %31 : vector<1x32x32xbf16> to vector<32x32xbf16>
    %33 = arith.truncf %30 : vector<32x128xf32> to vector<32x128xbf16>
    %cst_31 = arith.constant dense<0.000000e+00> : vector<32x128xf32>
    %34 = tpu.matmul %32, %33, %cst_31 {dimension_numbers = #tpu.dot_dimension_numbers<[1], [0], [0], [1], [0, 0, 1, 1], [], []>} : vector<32x32xbf16>, vector<32x128xbf16>, vector<32x128xf32> -> vector<32x128xf32>
    %c3 = arith.constant 3 : index
    %c0_32 = arith.constant 0 : index
    %c0_33 = arith.constant 0 : index
    %35 = vector.load %arg8[%c3, %c0_32, %c0_33] : memref<8x32x32xbf16, #tpu.memory_space<vmem>>, vector<1x32x32xbf16>
    %36 = vector.shape_cast %35 : vector<1x32x32xbf16> to vector<32x32xbf16>
    %cst_34 = arith.constant dense<0.000000e+00> : vector<32x128xf32>
    %37 = tpu.matmul %36, %10, %cst_34 {dimension_numbers = #tpu.dot_dimension_numbers<[1], [0], [0], [1], [0, 0, 1, 1], [], []>} : vector<32x32xbf16>, vector<32x128xbf16>, vector<32x128xf32> -> vector<32x128xf32>
    %38 = arith.addf %34, %37 : vector<32x128xf32>
    %c1_35 = arith.constant 1 : index
    %c0_36 = arith.constant 0 : index
    %c0_37 = arith.constant 0 : index
    %39 = vector.load %arg9[%c1_35, %c0_36, %c0_37] : memref<4x32x1xf32, #tpu.memory_space<vmem>>, vector<1x32x1xf32>
    %40 = vector.shape_cast %39 : vector<1x32x1xf32> to vector<32x1xf32>
    %41 = vector.broadcast %40 : vector<32x1xf32> to vector<32x128xf32>
    %42 = arith.addf %38, %41 : vector<32x128xf32>
    %cst_38 = arith.constant 0.000000e+00 : f32
    %43 = vector.broadcast %cst_38 : f32 to vector<32x128xf32>
    %44 = arith.maximumf %42, %43 : vector<32x128xf32>
    %45 = arith.truncf %44 : vector<32x128xf32> to vector<32x128xbf16>
    %c0_39 = arith.constant 0 : index
    %c0_40 = arith.constant 0 : index
    %46 = vector.load %arg6[%c0_39, %c0_40] : memref<128x128xbf16, #tpu.memory_space<vmem>>, vector<128x128xbf16>
    %cst_41 = arith.constant dense<0.000000e+00> : vector<32x128xf32>
    %47 = tpu.matmul %45, %46, %cst_41 {dimension_numbers = #tpu.dot_dimension_numbers<[1], [0], [0], [1], [0, 0, 1, 1], [], []>} : vector<32x128xbf16>, vector<128x128xbf16>, vector<32x128xf32> -> vector<32x128xf32>
    %c4 = arith.constant 4 : index
    %c0_42 = arith.constant 0 : index
    %c0_43 = arith.constant 0 : index
    %48 = vector.load %arg8[%c4, %c0_42, %c0_43] : memref<8x32x32xbf16, #tpu.memory_space<vmem>>, vector<1x32x32xbf16>
    %49 = vector.shape_cast %48 : vector<1x32x32xbf16> to vector<32x32xbf16>
    %50 = arith.truncf %47 : vector<32x128xf32> to vector<32x128xbf16>
    %cst_44 = arith.constant dense<0.000000e+00> : vector<32x128xf32>
    %51 = tpu.matmul %49, %50, %cst_44 {dimension_numbers = #tpu.dot_dimension_numbers<[1], [0], [0], [1], [0, 0, 1, 1], [], []>} : vector<32x32xbf16>, vector<32x128xbf16>, vector<32x128xf32> -> vector<32x128xf32>
    %c5 = arith.constant 5 : index
    %c0_45 = arith.constant 0 : index
    %c0_46 = arith.constant 0 : index
    %52 = vector.load %arg8[%c5, %c0_45, %c0_46] : memref<8x32x32xbf16, #tpu.memory_space<vmem>>, vector<1x32x32xbf16>
    %53 = vector.shape_cast %52 : vector<1x32x32xbf16> to vector<32x32xbf16>
    %cst_47 = arith.constant dense<0.000000e+00> : vector<32x128xf32>
    %54 = tpu.matmul %53, %28, %cst_47 {dimension_numbers = #tpu.dot_dimension_numbers<[1], [0], [0], [1], [0, 0, 1, 1], [], []>} : vector<32x32xbf16>, vector<32x128xbf16>, vector<32x128xf32> -> vector<32x128xf32>
    %55 = arith.addf %51, %54 : vector<32x128xf32>
    %c2_48 = arith.constant 2 : index
    %c0_49 = arith.constant 0 : index
    %c0_50 = arith.constant 0 : index
    %56 = vector.load %arg9[%c2_48, %c0_49, %c0_50] : memref<4x32x1xf32, #tpu.memory_space<vmem>>, vector<1x32x1xf32>
    %57 = vector.shape_cast %56 : vector<1x32x1xf32> to vector<32x1xf32>
    %58 = vector.broadcast %57 : vector<32x1xf32> to vector<32x128xf32>
    %59 = arith.addf %55, %58 : vector<32x128xf32>
    %60 = arith.truncf %59 : vector<32x128xf32> to vector<32x128xbf16>
    %c0_51 = arith.constant 0 : index
    %c0_52 = arith.constant 0 : index
    %61 = vector.load %arg7[%c0_51, %c0_52] : memref<128x128xbf16, #tpu.memory_space<vmem>>, vector<128x128xbf16>
    %cst_53 = arith.constant dense<0.000000e+00> : vector<32x128xf32>
    %62 = tpu.matmul %28, %61, %cst_53 {dimension_numbers = #tpu.dot_dimension_numbers<[1], [0], [0], [1], [0, 0, 1, 1], [], []>} : vector<32x128xbf16>, vector<128x128xbf16>, vector<32x128xf32> -> vector<32x128xf32>
    %c6 = arith.constant 6 : index
    %c0_54 = arith.constant 0 : index
    %c0_55 = arith.constant 0 : index
    %63 = vector.load %arg8[%c6, %c0_54, %c0_55] : memref<8x32x32xbf16, #tpu.memory_space<vmem>>, vector<1x32x32xbf16>
    %64 = vector.shape_cast %63 : vector<1x32x32xbf16> to vector<32x32xbf16>
    %65 = arith.truncf %62 : vector<32x128xf32> to vector<32x128xbf16>
    %cst_56 = arith.constant dense<0.000000e+00> : vector<32x128xf32>
    %66 = tpu.matmul %64, %65, %cst_56 {dimension_numbers = #tpu.dot_dimension_numbers<[1], [0], [0], [1], [0, 0, 1, 1], [], []>} : vector<32x32xbf16>, vector<32x128xbf16>, vector<32x128xf32> -> vector<32x128xf32>
    %c7 = arith.constant 7 : index
    %c0_57 = arith.constant 0 : index
    %c0_58 = arith.constant 0 : index
    %67 = vector.load %arg8[%c7, %c0_57, %c0_58] : memref<8x32x32xbf16, #tpu.memory_space<vmem>>, vector<1x32x32xbf16>
    %68 = vector.shape_cast %67 : vector<1x32x32xbf16> to vector<32x32xbf16>
    %cst_59 = arith.constant dense<0.000000e+00> : vector<32x128xf32>
    %69 = tpu.matmul %68, %45, %cst_59 {dimension_numbers = #tpu.dot_dimension_numbers<[1], [0], [0], [1], [0, 0, 1, 1], [], []>} : vector<32x32xbf16>, vector<32x128xbf16>, vector<32x128xf32> -> vector<32x128xf32>
    %70 = arith.addf %66, %69 : vector<32x128xf32>
    %c3_60 = arith.constant 3 : index
    %c0_61 = arith.constant 0 : index
    %c0_62 = arith.constant 0 : index
    %71 = vector.load %arg9[%c3_60, %c0_61, %c0_62] : memref<4x32x1xf32, #tpu.memory_space<vmem>>, vector<1x32x1xf32>
    %72 = vector.shape_cast %71 : vector<1x32x1xf32> to vector<32x1xf32>
    %73 = vector.broadcast %72 : vector<32x1xf32> to vector<32x128xf32>
    %74 = arith.addf %70, %73 : vector<32x128xf32>
    %75 = arith.truncf %74 : vector<32x128xf32> to vector<32x128xbf16>
    %76 = tpu.iota {dimensions = array<i32: 0>} : vector<128x128xi32>
    %c0_63 = arith.constant 0 : index
    %c0_64 = arith.constant 0 : index
    %77 = vector.load %arg10[%c0_63, %c0_64] : memref<1x128xi32, #tpu.memory_space<vmem>>, vector<1x128xi32>
    %78 = vector.broadcast %77 : vector<1x128xi32> to vector<128x128xi32>
    %79 = arith.cmpi eq, %76, %78 : vector<128x128xi32>
    %80 = arith.extui %79 : vector<128x128xi1> to vector<128x128xi32>
    %81 = arith.sitofp %80 : vector<128x128xi32> to vector<128x128xf32>
    %82 = arith.truncf %81 : vector<128x128xf32> to vector<128x128xbf16>
    %83 = tpu.iota {dimensions = array<i32: 0>} : vector<128x128xi32>
    %c0_65 = arith.constant 0 : index
    %c0_66 = arith.constant 0 : index
    %84 = vector.load %arg11[%c0_65, %c0_66] : memref<1x128xi32, #tpu.memory_space<vmem>>, vector<1x128xi32>
    %85 = vector.broadcast %84 : vector<1x128xi32> to vector<128x128xi32>
    %86 = arith.cmpi eq, %83, %85 : vector<128x128xi32>
    %87 = arith.extui %86 : vector<128x128xi1> to vector<128x128xi32>
    %88 = arith.sitofp %87 : vector<128x128xi32> to vector<128x128xf32>
    %89 = arith.truncf %88 : vector<128x128xf32> to vector<128x128xbf16>
    %cst_67 = arith.constant dense<0.000000e+00> : vector<32x128xf32>
    %90 = tpu.matmul %75, %82, %cst_67 {dimension_numbers = #tpu.dot_dimension_numbers<[1], [0], [0], [1], [0, 0, 1, 1], [], []>} : vector<32x128xbf16>, vector<128x128xbf16>, vector<32x128xf32> -> vector<32x128xf32>
    %cst_68 = arith.constant dense<0.000000e+00> : vector<32x128xf32>
    %91 = tpu.matmul %60, %89, %cst_68 {dimension_numbers = #tpu.dot_dimension_numbers<[1], [0], [0], [1], [0, 0, 1, 1], [], []>} : vector<32x128xbf16>, vector<128x128xbf16>, vector<32x128xf32> -> vector<32x128xf32>
    %92 = arith.mulf %90, %91 : vector<32x128xf32>
    %cst_69 = arith.constant dense<0.000000e+00> : vector<128xf32>
    %93 = vector.multi_reduction <add>, %92, %cst_69 [0] : vector<32x128xf32> to vector<128xf32>
    %94 = vector.shape_cast %93 : vector<128xf32> to vector<1x128xf32>
    %c0_70 = arith.constant 0 : index
    %c0_71 = arith.constant 0 : index
    %95 = vector.load %arg12[%c0_70, %c0_71] : memref<1x128xf32, #tpu.memory_space<vmem>>, vector<1x128xf32>
    tpu.vector_store %arg12[%c0_70, %c0_71], %94 {strides = array<i32>} : memref<1x128xf32, #tpu.memory_space<vmem>>, vector<1x128xf32>,
    return
  }
}

</mosaic_0001>

<bundles_post_ra>
// kernel: tpu_custom_call.1
= control target key start
LH: loop header
LB: loop body
LE: loop exit
PB: predicated region body
PF: predicated region fallthrough
CT: control target
= control target key end

     0   :  { %17 = vsyncpa [#allocation3], 0  ;;  %s3617_s0 = inlined_call_operand.hbm [shape: bf16[32,128], index: 0, kind: input, shape index: {}]   ;;  %s3618_s1 = inlined_call_operand.hbm [shape: bf16[768,128], index: 1, kind: input, shape index: {}]   ;;  %s3619_s2 = inlined_call_operand.hbm [shape: bf16[32,32], index: 2, kind: input, shape index: {}]   ;;  %s3620_s3 = inlined_call_operand.hbm [shape: bf16[32,768], index: 3, kind: input, shape index: {}]   ;;  %s3621_s4 = inlined_call_operand.vmem [shape: f32[32,128], index: 4, kind: input, shape index: {}]   ;;  %s3622_s5 = inlined_call_operand.hbm [shape: f32[32,128], index: 5, kind: input, shape index: {}]   ;;  %s3623_s6 = inlined_call_operand.hbm [shape: bf16[128,128], index: 6, kind: input, shape index: {}]   ;;  %s3624_s7 = inlined_call_operand.hbm [shape: bf16[128,128], index: 7, kind: input, shape index: {}]   ;;  %s3625_s8 = inlined_call_operand.vmem [shape: bf16[8,32,32], index: 8, kind: input, shape index: {}]   ;;  %s3626_s9 = inlined_call_operand.vmem [shape: f32[4,32,1], index: 9, kind: input, shape index: {}]   ;;  %s3627_s10 = inlined_call_operand.vmem [shape: s32[1,128], index: 10, kind: input, shape index: {}]   ;;  %s3628_s11 = inlined_call_operand.vmem [shape: s32[1,128], index: 11, kind: input, shape index: {}]   ;;  %s3629_s12 = inlined_call_operand.hbm [shape: f32[1,128], index: 12, kind: output, shape index: {}]  }
   0x1   :  { %18 = vsyncpa [#allocation6], 0 }
   0x2   :  { %19 = vsyncpa [#allocation9], 0 }
   0x3   :  { %20 = vsyncpa [#allocation12], 0 }
   0x4   :  { %21 = vsyncpa [#allocation4], 0  ;;  %s3044_s21 = smov [#allocation5]   ;;  %s3045_s23 = smov [#allocation8]  }
   0x5   :  { %s39_s22 = sshll.u32 %s3044_s21, 4  ;;  %s63_s24 = sshll.u32 %s3045_s23, 4  ;;  %s40_s22 = int_to_ptr.vmem [resolvable:$true] %s39_s22  ;;  %s3125_s24 = int_to_ptr.vmem [resolvable:$true] %s63_s24 }
   0x6   :  { %s2858_s27 = scalar_lea.hbm %s3618_s1, 6144 }
   0x7   :  { %p2859_p0 = scmp.ne.s32.totalorder %s3618_s1, %s2858_s27  ;;  %p2862_p1 = scmp.lt.u32.totalorder %s2858_s27, %s3618_s1 }
   0x9   :  { %p2864_p2 = pnand %p2862_p1, %p2859_p0 }
   0xb   :  { %2867 = shalt.err (!%p2864_p2)
}
   0xc   :  { %s2868_s14 = scalar_lea.vmem %s40_s22, 6144  ;;  %p2873_p4 = scmp.lt.s32.totalorder %s40_s22, %s40_s22 }
   0xd   :  { %p2869_p3 = scmp.ne.s32.totalorder %s40_s22, %s2868_s14  ;;  %p2874_p5 = scmp.lt.s32.totalorder %s2868_s14, %s2868_s14 }
   0xf   :  { %p2875_p6 = por %p2874_p5, %p2873_p4 }
  0x11   :  { %p2876_p7 = pnand %p2875_p6, %p2869_p3 }
  0x13   :  { %2879 = shalt.err (!%p2876_p7)
}
  0x14   :  { %s3046_s15 = smov 64   ;;  %s3047_s16 = smov 4  }
  0x15   :  { %45 = dma.hbm_to_vmem [thread:$0]  %s3618_s1, 6144, %s40_s22, [#allocation6], %s3046_s15, %s3046_s15, %s3047_s16  }
  0x16   :  { %s2880_s21 = scalar_lea.hbm %s3620_s3, 1536 }
  0x17   :  { %p2881_p8 = scmp.ne.s32.totalorder %s3620_s3, %s2880_s21  ;;  %p2884_p9 = scmp.lt.u32.totalorder %s2880_s21, %s3620_s3 }
  0x19   :  { %p2886_p10 = pnand %p2884_p9, %p2881_p8 }
  0x1b   :  { %2889 = shalt.err (!%p2886_p10)
}
  0x1c   :  { %s2890_s28 = scalar_lea.vmem %s3125_s24, 1536  ;;  %p2895_p12 = scmp.lt.s32.totalorder %s3125_s24, %s3125_s24 }
  0x1d   :  { %p2891_p11 = scmp.ne.s32.totalorder %s3125_s24, %s2890_s28  ;;  %p2896_p13 = scmp.lt.s32.totalorder %s2890_s28, %s2890_s28 }
  0x1f   :  { %p2897_p0 = por %p2896_p13, %p2895_p12 }
  0x21   :  { %p2898_p1 = pnand %p2897_p0, %p2891_p11 }
  0x23   :  { %2901 = shalt.err (!%p2898_p1)
}
  0x24   :  { %s3048_s1 = smov 384   ;;  %s3049_s22 = smov 24  }
  0x25   :  { %69 = dma.hbm_to_vmem [thread:$0]  %s3620_s3, 1536, %s3125_s24, [#allocation9], %s3048_s1, %s3048_s1, %s3049_s22  }
  0x26   :  { %s3050_s13 = smov [#allocation11]   ;;  %s3051_s17 = smov [#allocation2]  }
  0x27   :  { %s89_s14 = sshll.u32 %s3050_s13, 4  ;;  %s27_s18 = sshll.u32 %s3051_s17, 4  ;;  %s90_s14 = int_to_ptr.vmem [resolvable:$true] %s89_s14  ;;  %s3159_s18 = int_to_ptr.vmem [resolvable:$true] %s27_s18 }
  0x28   :  { %s2902_s21 = scalar_lea.hbm %s3623_s6, 1024 }
  0x29   :  { %p2903_p2 = scmp.ne.s32.totalorder %s3623_s6, %s2902_s21  ;;  %p2906_p3 = scmp.lt.u32.totalorder %s2902_s21, %s3623_s6 }
  0x2b   :  { %p2908_p4 = pnand %p2906_p3, %p2903_p2 }
  0x2d   :  { %2911 = shalt.err (!%p2908_p4)
}
  0x2e   :  { %s2912_s3 = scalar_lea.vmem %s90_s14, 1024  ;;  %p2917_p6 = scmp.lt.s32.totalorder %s90_s14, %s90_s14 }
  0x2f   :  { %p2913_p5 = scmp.ne.s32.totalorder %s90_s14, %s2912_s3  ;;  %p2918_p7 = scmp.lt.s32.totalorder %s2912_s3, %s2912_s3 }
  0x31   :  { %p2919_p8 = por %p2918_p7, %p2917_p6 }
  0x33   :  { %p2920_p9 = pnand %p2919_p8, %p2913_p5 }
  0x35   :  { %2923 = shalt.err (!%p2920_p9)
}
  0x36   :  { %95 = dma.hbm_to_vmem [thread:$0]  %s3623_s6, 1024, %s90_s14, [#allocation12], %s3046_s15, %s3046_s15, %s3047_s16  }
  0x37   :  { %s2924_s29 = scalar_lea.hbm %s3617_s0, 256 }
  0x38   :  { %p2925_p10 = scmp.ne.s32.totalorder %s3617_s0, %s2924_s29  ;;  %p2928_p11 = scmp.lt.u32.totalorder %s2924_s29, %s3617_s0 }
  0x3a   :  { %p2930_p12 = pnand %p2928_p11, %p2925_p10 }
  0x3c   :  { %2933 = shalt.err (!%p2930_p12)
}
  0x3d   :  { %s2934_s20 = scalar_lea.vmem %s3159_s18, 256  ;;  %p2939_p0 = scmp.lt.s32.totalorder %s3159_s18, %s3159_s18 }
  0x3e   :  { %p2935_p13 = scmp.ne.s32.totalorder %s3159_s18, %s2934_s20  ;;  %p2940_p1 = scmp.lt.s32.totalorder %s2934_s20, %s2934_s20 }
  0x40   :  { %p2941_p2 = por %p2940_p1, %p2939_p0 }
  0x42   :  { %p2942_p3 = pnand %p2941_p2, %p2935_p13 }
  0x44   :  { %2945 = shalt.err (!%p2942_p3)
}
  0x45   :  { %33 = dma.hbm_to_vmem [thread:$0]  %s3617_s0, 256, %s3159_s18, [#allocation3], %s3046_s15, %s3046_s15, %s3047_s16  }
  0x46   :  { %s3052_s21 = smov [#allocation7]   ;;  %s3053_s25 = smov [#allocation10]  }
  0x47   :  { %s51_s23 = sshll.u32 %s3052_s21, 4  ;;  %s77_s26 = sshll.u32 %s3053_s25, 4  ;;  %s52_s23 = int_to_ptr.vmem [resolvable:$true] %s51_s23  ;;  %s3196_s26 = int_to_ptr.vmem [resolvable:$true] %s77_s26 }
  0x48   :  { %s2946_s24 = scalar_lea.hbm %s3619_s2, 256 }
  0x49   :  { %p2947_p4 = scmp.ne.s32.totalorder %s3619_s2, %s2946_s24  ;;  %p2950_p5 = scmp.lt.u32.totalorder %s2946_s24, %s3619_s2 }
  0x4b   :  { %p2952_p6 = pnand %p2950_p5, %p2947_p4 }
  0x4d   :  { %2955 = shalt.err (!%p2952_p6)
}
  0x4e   :  { %s2956_s0 = scalar_lea.vmem %s52_s23, 256  ;;  %p2961_p8 = scmp.lt.s32.totalorder %s52_s23, %s52_s23 }
  0x4f   :  { %p2957_p7 = scmp.ne.s32.totalorder %s52_s23, %s2956_s0  ;;  %p2962_p9 = scmp.lt.s32.totalorder %s2956_s0, %s2956_s0 }
  0x51   :  { %p2963_p10 = por %p2962_p9, %p2961_p8 }
  0x53   :  { %p2964_p11 = pnand %p2963_p10, %p2957_p7 }
  0x55   :  { %2967 = shalt.err (!%p2964_p11)
}
  0x56   :  { %57 = dma.hbm_to_vmem [thread:$0]  %s3619_s2, 256, %s52_s23, [#allocation6], %s3046_s15, %s3046_s15, %s3047_s16  }
  0x57   :  { %s2968_s19 = scalar_lea.hbm %s3622_s5, 512 }
  0x58   :  { %p2969_p12 = scmp.ne.s32.totalorder %s3622_s5, %s2968_s19  ;;  %p2972_p13 = scmp.lt.u32.totalorder %s2968_s19, %s3622_s5 }
  0x5a   :  { %p2974_p0 = pnand %p2972_p13, %p2969_p12 }
  0x5c   :  { %2977 = shalt.err (!%p2974_p0)
}
  0x5d   :  { %s2978_s25 = scalar_lea.vmem %s3196_s26, 512  ;;  %p2983_p2 = scmp.lt.s32.totalorder %s3196_s26, %s3196_s26 }
  0x5e   :  { %p2979_p1 = scmp.ne.s32.totalorder %s3196_s26, %s2978_s25  ;;  %p2984_p3 = scmp.lt.s32.totalorder %s2978_s25, %s2978_s25 }
  0x60   :  { %p2985_p4 = por %p2984_p3, %p2983_p2 }
  0x62   :  { %p2986_p5 = pnand %p2985_p4, %p2979_p1 }
  0x64   :  { %2989 = shalt.err (!%p2986_p5)
}
  0x65   :  { %s3054_s2 = smov 128   ;;  %s3055_s23 = smov 8  }
  0x66   :  { %83 = dma.hbm_to_vmem [thread:$0]  %s3622_s5, 512, %s3196_s26, [#allocation9], %s3054_s2, %s3054_s2, %s3055_s23  }
  0x67   :  { %s3056_s24 = smov [#allocation13]   ;;  %s2990_s29 = scalar_lea.hbm %s3624_s7, 1024 }
  0x68   :  { %s101_s28 = sshll.u32 %s3056_s24, 4  ;;  %p2991_p6 = scmp.ne.s32.totalorder %s3624_s7, %s2990_s29  ;;  %s102_s28 = int_to_ptr.vmem [resolvable:$true] %s101_s28 }
  0x69   :  { %p2994_p7 = scmp.lt.u32.totalorder %s2990_s29, %s3624_s7 }
  0x6b   :  { %p2996_p8 = pnand %p2994_p7, %p2991_p6 }
  0x6d   :  { %2999 = shalt.err (!%p2996_p8)
}
  0x6e   :  { %s3000_s17 = scalar_lea.vmem %s102_s28, 1024  ;;  %p3005_p10 = scmp.lt.s32.totalorder %s102_s28, %s102_s28 }
  0x6f   :  { %p3001_p9 = scmp.ne.s32.totalorder %s102_s28, %s3000_s17  ;;  %p3006_p11 = scmp.lt.s32.totalorder %s3000_s17, %s3000_s17 }
  0x71   :  { %p3007_p12 = por %p3006_p11, %p3005_p10 }
  0x73   :  { %p3008_p13 = pnand %p3007_p12, %p3001_p9 }
  0x75   :  { %3011 = shalt.err (!%p3008_p13)
}
  0x76   :  { %107 = dma.hbm_to_vmem [thread:$0]  %s3624_s7, 1024, %s102_s28, [#allocation12], %s3046_s15, %s3046_s15, %s3047_s16  }
  0x77   :  { %3034 = dma.done.wait [#allocation3], 256  }
  0x78   :  { %3035 = vsyncadd [#allocation3], 4294967040 }
  0x79   :  { %3036 = dma.done.wait [#allocation6], 6400  }
  0x7a   :  { %3037 = vsyncadd [#allocation6], 4294960896 }
  0x7b   :  { %3038 = dma.done.wait [#allocation9], 2048  }
  0x7c   :  { %3039 = vsyncadd [#allocation9], 4294965248 }
  0x7d   :  { %3040 = dma.done.wait [#allocation12], 2048  }
  0x7e   :  { %3041 = vsyncadd [#allocation12], 4294965248  ;;  %v2756_v0 = vld [vmem:[#allocation2] sm:$0xff]   ;;  %v2757_v1 = vld [vmem:[#allocation5 + $0x40] sm:$0xff]   ;;  %vm172_vm0 = vcmask 261120  }
  0x7f   :  { %2530 = vmatprep.subr.bf16.mxu0 %v2756_v0  ;;  %v2758_v2 = vld [vmem:[#allocation5] sm:$0xff]   ;;  %2354 = vmatprep.subr.bf16.mxu1 %v2757_v1  ;;  %v2759_v3 = vld [vmem:[#allocation2 + $0x8] sm:$0xff]   ;;  %v2760_v4 = vld [vmem:[#allocation5 + $0x48] sm:$0xff]  }
  0x80   :  { %2531 = vmatpush3.bf16.msra.mxu0 %v2756_v0  ;;  %2355 = vmatpush3.bf16.msra.mxu1 %v2758_v2  ;;  %v2761_v5 = vld [vmem:[#allocation5 + $0x8] sm:$0xff]   ;;  %v2762_v6 = vld [vmem:[#allocation7] sm:$0xff]   ;;  %v2764_v8 = vld [vmem:[#allocation5 + $0x50] sm:$0xff]  }
  0x81   :  { %2532 = vmatprep.subr.bf16.mxu0 %v2759_v3  ;;  %2356 = vmatprep.subr.bf16.mxu1 %v2760_v4  ;;  %v2763_v7 = vld [vmem:[#allocation7 + $0x8] sm:$0xff]   ;;  %v2765_v9 = vld [vmem:[#allocation5 + $0xc0] sm:$0xff]   ;;  %v2766_v10 = vld [vmem:[#allocation5 + $0x10] sm:$0xff]  }
  0x82   :  { %2534 = vmatprep.mubr.msk.bf16.mxu0 %vm172_vm0, %v2762_v6  ;;  %v2767_v11 = vld [vmem:[#allocation5 + $0x80] sm:$0xff]   ;;  %v2768_v12 = vld [vmem:[#allocation5 + $0x58] sm:$0xff]   ;;  %v2769_v13 = vld [vmem:[#allocation5 + $0xc8] sm:$0xff]  }
  0x83   :  { %v2770_v14 = vld [vmem:[#allocation5 + $0x18] sm:$0xff]   ;;  %v2771_v15 = vld [vmem:[#allocation5 + $0x88] sm:$0xff]   ;;  %v2772_v16 = vld [vmem:[#allocation5 + $0x60] sm:$0xff]  }
  0x84   :  { %2533 = vmatpush3.bf16.msra.mxu0 %v2759_v3  ;;  %2357 = vmatpush3.bf16.msra.mxu1 %v2761_v5  ;;  %v2773_v17 = vld [vmem:[#allocation5 + $0xd0] sm:$0xff]   ;;  %v2774_v18 = vld [vmem:[#allocation5 + $0x20] sm:$0xff]   ;;  %v2776_v20 = vld [vmem:[#allocation5 + $0x68] sm:$0xff]  }
  0x85   :  { %2358 = vmatprep.subr.bf16.mxu1 %v2764_v8  ;;  %2382 = vmatprep.subr.bf16.mxu0 %v2765_v9  ;;  %v2775_v19 = vld [vmem:[#allocation5 + $0x90] sm:$0xff]   ;;  %v2777_v21 = vld [vmem:[#allocation5 + $0xd8] sm:$0xff]   ;;  %v2778_v22 = vld [vmem:[#allocation5 + $0x28] sm:$0xff]  }
  0x86   :  { %v2779_v23 = vld [vmem:[#allocation5 + $0x98] sm:$0xff]   ;;  %v2780_v24 = vld [vmem:[#allocation5 + $0x70] sm:$0xff]   ;;  %v2781_v25 = vld [vmem:[#allocation5 + $0xe0] sm:$0xff]  }
  0x87   :  { %2535 = vmatmul.mubr.msk.bf16.vlgmr.msra.gmra.mrb[0].mxu0 %vm172_vm0, %v2763_v7  ;;  %v2782_v26 = vld [vmem:[#allocation5 + $0x30] sm:$0xff]   ;;  %v2783_v27 = vld [vmem:[#allocation5 + $0xa0] sm:$0xff]   ;;  %v2784_v28 = vld [vmem:[#allocation5 + $0x78] sm:$0xff]  }
  0x88   :  { %2359 = vmatpush3.bf16.msra.mxu1 %v2766_v10  ;;  %2383 = vmatpush3.bf16.msra.mxu0 %v2767_v11  ;;  %v2785_v29 = vld [vmem:[#allocation5 + $0xe8] sm:$0xff]   ;;  %v2786_v30 = vld [vmem:[#allocation5 + $0x38] sm:$0xff]   ;;  %v2791_v34 = vld [vmem:[#allocation5 + $0xf0] sm:$0xff]  }
  0x89   :  { %2360 = vmatprep.subr.bf16.mxu1 %v2768_v12  ;;  %2384 = vmatprep.subr.bf16.mxu0 %v2769_v13  ;;  %v2787_v31 = vld [vmem:[#allocation5 + $0xa8] sm:$0xff]   ;;  %v2792_v35 = vld [vmem:[#allocation5 + $0x140] sm:$0xff]   ;;  %v2793_v36 = vld [vmem:[#allocation5 + $0xb0] sm:$0xff]  }
  0x8a   :  { %v2788_v32 = vld [vmem:[#allocation8] ss:$24 sps:$4 sm:$0xff]   ;;  %v2790_v33 = vld [vmem:[#allocation8 + $0x4] ss:$24 sps:$4 sm:$0xff]   ;;  %v2794_v37 = vld [vmem:[#allocation5 + $0x100] sm:$0xff]  }
  0x8b   :  { %720 = vmatprep.mubr.bf16.mxu1 %v2790_v33  ;;  %v2795_v38 = vld [vmem:[#allocation5 + $0xf8] sm:$0xff]   ;;  %v2796_v39 = vld [vmem:[#allocation5 + $0x148] sm:$0xff]   ;;  %v2802_v44 = vld [vmem:[#allocation5 + $0x150] sm:$0xff]  }
  0x8c   :  { %2361 = vmatpush3.bf16.msra.mxu1 %v2770_v14  ;;  %2385 = vmatpush3.bf16.msra.mxu0 %v2771_v15  ;;  %v2797_v40 = vld [vmem:[#allocation5 + $0xb8] sm:$0xff]   ;;  %v2798_v41 = vld [vmem:[#allocation5 + $0x108] sm:$0xff]   ;;  %v2803_v45 = vld [vmem:[#allocation5 + $0x110] sm:$0xff]  }
  0x8d   :  { %2362 = vmatprep.subr.bf16.mxu1 %v2772_v16  ;;  %2386 = vmatprep.subr.bf16.mxu0 %v2773_v17  ;;  %v2799_v42 = vld [vmem:[#allocation8 + $0x8] ss:$24 sps:$4 sm:$0xff]   ;;  %v2801_v43 = vld [vmem:[#allocation8 + $0xc] ss:$24 sps:$4 sm:$0xff]   ;;  %v2806_v48 = vld [vmem:[#allocation5 + $0x160] sm:$0xff]  }
  0x8e   :  { %769 = vmatprep.mubr.bf16.mxu0 %v2801_v43  ;;  %v2804_v46 = vld [vmem:[#allocation5 + $0x158] sm:$0xff]   ;;  %v2807_v50 = vld [vmem:[#allocation5 + $0x120] sm:$0xff]   ;;  %v2810_v52 = vld [vmem:[#allocation5 + $0x168] sm:$0xff]  }
  0x8f   :  { %v2805_v47 = vld [vmem:[#allocation5 + $0x118] sm:$0xff]   ;;  %v2813_v53 = vld [vmem:[#allocation8 + $0x3c] ss:$24 sps:$4 sm:$0xff]   ;;  %v2815_v54 = vld [vmem:[#allocation8 + $0x38] ss:$24 sps:$4 sm:$0xff]  }
  0x90   :  { %2363 = vmatpush3.bf16.msra.mxu1 %v2774_v18  ;;  %2387 = vmatpush3.bf16.msra.mxu0 %v2775_v19  ;;  %v2808_v49 = vld [vmem:[#allocation8 + $0x34] ss:$24 sps:$4 sm:$0xff]   ;;  %v2811_v51 = vld [vmem:[#allocation8 + $0x30] ss:$24 sps:$4 sm:$0xff]   ;;  %v2812_v55 = vld [vmem:[#allocation5 + $0x128] sm:$0xff]  }
  0x91   :  { %2364 = vmatprep.subr.bf16.mxu1 %v2776_v20  ;;  %2388 = vmatprep.subr.bf16.mxu0 %v2777_v21  ;;  %v2816_v56 = vld [vmem:[#allocation5 + $0x170] sm:$0xff]   ;;  %v2822_v57 = vld [vmem:[#allocation8 + $0x14] ss:$24 sps:$4 sm:$0xff]   ;;  %v2820_v63 = vld [vmem:[#allocation8 + $0x10] ss:$24 sps:$4 sm:$0xff]  }
  0x92   :  { %v2817_v58 = vld [vmem:[#allocation5 + $0x130] sm:$0xff]   ;;  %v2818_v59 = vld [vmem:[#allocation5 + $0x178] sm:$0xff]   ;;  %v3254_v0 = vld [vmem:[#allocation11 + $0x10] sm:$0xff]  }
  0x93   :  { %v3247_v60 = vld [vmem:[#allocation11] sm:$0xff]   ;;  %v3249_v61 = vld [vmem:[#allocation11 + $0x8] sm:$0xff]   ;;  %v3256_v2 = vld [vmem:[#allocation11 + $0x18] sm:$0xff]  }
  0x94   :  { %2365 = vmatpush3.bf16.msra.mxu1 %v2778_v22  ;;  %2389 = vmatpush3.bf16.msra.mxu0 %v2779_v23  ;;  %v2819_v62 = vld [vmem:[#allocation5 + $0x138] sm:$0xff]   ;;  %v2823_v1 = vld [vmem:[#allocation8 + $0x44] ss:$24 sps:$4 sm:$0xff]   ;;  %v2825_v4 = vld [vmem:[#allocation8 + $0x40] ss:$24 sps:$4 sm:$0xff]  }
  0x95   :  { %2366 = vmatprep.subr.bf16.mxu1 %v2780_v24  ;;  %2390 = vmatprep.subr.bf16.mxu0 %v2781_v25  ;;  %v3260_v3 = vld [vmem:[#allocation11 + $0x20] sm:$0xff]   ;;  %v3264_v5 = vld [vmem:[#allocation11 + $0x28] sm:$0xff]   ;;  %v3271_v6 = vld [vmem:[#allocation11 + $0x30] sm:$0xff]  }
  0x96   :  { %v3275_v7 = vld [vmem:[#allocation11 + $0x38] sm:$0xff]   ;;  %v3279_v8 = vld [vmem:[#allocation13] sm:$0xff]   ;;  %v3283_v9 = vld [vmem:[#allocation13 + $0x8] sm:$0xff]  }
  0x97   :  { %v3287_v10 = vld [vmem:[#allocation13 + $0x10] sm:$0xff]   ;;  %v3289_v11 = vld [vmem:[#allocation13 + $0x18] sm:$0xff]   ;;  %v3295_v12 = vld [vmem:[#allocation13 + $0x20] sm:$0xff]  }
  0x98   :  { %2367 = vmatpush3.bf16.msra.mxu1 %v2782_v26  ;;  %2391 = vmatpush3.bf16.msra.mxu0 %v2783_v27  ;;  %v3299_v13 = vld [vmem:[#allocation13 + $0x28] sm:$0xff]   ;;  %v3303_v14 = vld [vmem:[#allocation13 + $0x30] sm:$0xff]   ;;  %v3307_v15 = vld [vmem:[#allocation13 + $0x38] sm:$0xff]  }
  0x99   :  { %2368 = vmatprep.subr.bf16.mxu1 %v2784_v28  ;;  %2392 = vmatprep.subr.bf16.mxu0 %v2785_v29  ;;  %v148_v16 = vld [vmem:[%s3621_s4 + $0x10] sm:$0xff]  ;;  %v146_v17 = vld [vmem:[%s3621_s4] sm:$0xff]  ;;  %v149_v19 = vld [vmem:[%s3621_s4 + $0x18] sm:$0xff] }
  0x9a   :  { %v147_v22 = vld [vmem:[%s3621_s4 + $0x8] sm:$0xff] }
  0x9c   :  { %2369 = vmatpush3.bf16.msra.mxu1 %v2786_v30  ;;  %2393 = vmatpush3.bf16.msra.mxu0 %v2787_v31 }
  0x9d   :  { %2394 = vmatprep.subr.bf16.mxu0 %v2791_v34  ;;  %2410 = vmatprep.subr.bf16.mxu1 %v2792_v35 }
  0x9f   :  { %721 = vmatmul.mubr.bf16.vlgmr.msra.gmra.mrb[0].mxu1 %v2788_v32 }
  0xa0   :  { %2395 = vmatpush3.bf16.msra.mxu0 %v2793_v36  ;;  %2411 = vmatpush3.bf16.msra.mxu1 %v2794_v37  ;;  %v336_v36 = vld [vmem:[#allocation10] sm:$0xff] }
  0xa1   :  { %2396 = vmatprep.subr.bf16.mxu0 %v2795_v38  ;;  %2412 = vmatprep.subr.bf16.mxu1 %v2796_v39  ;;  %v337_v38 = vld [vmem:[#allocation10 + $0x8] sm:$0xff] }
  0xa2   :  { %728 = vmatprep.mubr.bf16.mxu1 %v2808_v49  ;;  %v338_v49 = vld [vmem:[#allocation10 + $0x10] sm:$0xff] }
  0xa4   :  { %2397 = vmatpush3.bf16.msra.mxu0 %v2797_v40  ;;  %2413 = vmatpush3.bf16.msra.mxu1 %v2798_v41 }
  0xa5   :  { %2414 = vmatprep.subr.bf16.mxu1 %v2802_v44  ;;  %2538 = vmatprep.subr.bf16.mxu0 %v3247_v60 }
  0xa7   :  { %770 = vmatmul.mubr.bf16.vlgmr.msra.gmra.mrb[4].mxu0 %v2799_v42  ;;  %729 = vmatmul.mubr.bf16.gmra.mrb[4].mxu1 %v2811_v51 }
  0xa8   :  { %2415 = vmatpush3.bf16.msra.mxu1 %v2803_v45  ;;  %777 = vmatprep.mubr.bf16.mxu0 %v2813_v53 }
  0xa9   :  { %2416 = vmatprep.subr.bf16.mxu1 %v2804_v46  ;;  %818 = vmatprep.mubr.bf16.mxu1 %v2822_v57 }
  0xaa   :  { %2539 = vmatpush3.bf16.msra.mxu0 %v3247_v60 }
  0xab   :  { %2540 = vmatprep.subr.bf16.mxu0 %v3249_v61 }
  0xac   :  { %2417 = vmatpush3.bf16.msra.mxu1 %v2805_v47 }
  0xad   :  { %2418 = vmatprep.subr.bf16.mxu1 %v2806_v48 }
  0xae   :  { %2541 = vmatpush3.bf16.msra.mxu0 %v3249_v61 }
  0xaf   :  { %778 = vmatmul.mubr.bf16.gmra.mrb[8].mxu0 %v2815_v54  ;;  %2542 = vmatprep.subr.bf16.mxu0 %v3254_v0  ;;  %v339_v54 = vld [vmem:[#allocation10 + $0x18] sm:$0xff] }
  0xb0   :  { %2419 = vmatpush3.bf16.msra.mxu1 %v2807_v50 }
  0xb1   :  { %2420 = vmatprep.subr.bf16.mxu1 %v2810_v52 }
  0xb2   :  { %2543 = vmatpush3.bf16.msra.mxu0 %v3254_v0 }
  0xb3   :  { %2544 = vmatprep.subr.bf16.mxu0 %v3256_v2 }
  0xb4   :  { %2421 = vmatpush3.bf16.msra.mxu1 %v2812_v55 }
  0xb5   :  { %2422 = vmatprep.subr.bf16.mxu1 %v2816_v56 }
  0xb6   :  { %2545 = vmatpush3.bf16.msra.mxu0 %v3256_v2 }
  0xb7   :  { %2546 = vmatprep.subr.bf16.mxu0 %v3260_v3 }
  0xb8   :  { %2423 = vmatpush3.bf16.msra.mxu1 %v2817_v58 }
  0xb9   :  { %2424 = vmatprep.subr.bf16.mxu1 %v2818_v59 }
  0xba   :  { %2547 = vmatpush3.bf16.msra.mxu0 %v3260_v3 }
  0xbb   :  { %2548 = vmatprep.subr.bf16.mxu0 %v3264_v5 }
  0xbc   :  { %2425 = vmatpush3.bf16.msra.mxu1 %v2819_v62 }
  0xbd   :  { %2574 = vmatprep.subr.bf16.mxu1 %v3279_v8 }
  0xbe   :  { %2549 = vmatpush3.bf16.msra.mxu0 %v3264_v5 }
  0xbf   :  { %819 = vmatmul.mubr.bf16.vlgmr.msra.gmra.mrb[8].mxu1 %v2820_v63  ;;  %2550 = vmatprep.subr.bf16.mxu0 %v3271_v6 }
  0xc0   :  { %826 = vmatprep.mubr.bf16.mxu1 %v2823_v1  ;;  %2575 = vmatpush3.bf16.msra.mxu1 %v3279_v8 }
  0xc1   :  { %2576 = vmatprep.subr.bf16.mxu1 %v3283_v9 }
  0xc2   :  { %2551 = vmatpush3.bf16.msra.mxu0 %v3271_v6 }
  0xc3   :  { %2552 = vmatprep.subr.bf16.mxu0 %v3275_v7 }
  0xc4   :  { %2577 = vmatpush3.bf16.msra.mxu1 %v3283_v9 }
  0xc5   :  { %2578 = vmatprep.subr.bf16.mxu1 %v3287_v10 }
  0xc6   :  { %2553 = vmatpush3.bf16.msra.mxu0 %v3275_v7 }
  0xc7   :  { %827 = vmatmul.mubr.bf16.gmra.mrb[12].mxu1 %v2825_v4 }
  0xc8   :  { %2579 = vmatpush3.bf16.msra.mxu1 %v3287_v10 }
  0xc9   :  { %2580 = vmatprep.subr.bf16.mxu1 %v3289_v11 }
  0xcc   :  { %2581 = vmatpush3.bf16.msra.mxu1 %v3289_v11 }
  0xcd   :  { %2582 = vmatprep.subr.bf16.mxu1 %v3295_v12 }
  0xd0   :  { %2583 = vmatpush3.bf16.msra.mxu1 %v3295_v12 }
  0xd1   :  { %2584 = vmatprep.subr.bf16.mxu1 %v3299_v13 }
  0xd4   :  { %2585 = vmatpush3.bf16.msra.mxu1 %v3299_v13 }
  0xd5   :  { %2586 = vmatprep.subr.bf16.mxu1 %v3303_v14 }
  0xd8   :  { %2587 = vmatpush3.bf16.msra.mxu1 %v3303_v14 }
  0xd9   :  { %2588 = vmatprep.subr.bf16.mxu1 %v3307_v15 }
  0xdc   :  { %2589 = vmatpush3.bf16.msra.mxu1 %v3307_v15 }
  0xdd   :  { %2610 = vmatprep.subr.bf16.mxu1 %v3247_v60 }
 0x15a   :  { %v2536_v18 = vpop.f32.mrb[0].mxu0 }
 0x15b   :  { %v222_v20 = vadd.f32 %v2536_v18, %v148_v16  ;;  %v213_v21 = vpop.f32.mrb[1].mxu0 }
 0x15c   :  { %v214_v23 = vadd.f32 %v213_v21, %v146_v17  ;;  %v2537_v24 = vpop.f32.mrb[2].mxu0 }
 0x15d   :  { %v225_v25 = vadd.f32 %v2537_v24, %v149_v19  ;;  %v216_v26 = vpop.f32.mrb[3].mxu0 }
 0x15e   :  { %v217_v27 = vadd.f32 %v216_v26, %v147_v22 }
 0x15f   :  { %v3324_v28 = vpack.c.bf16 %v225_v25, %v222_v20 }
 0x160   :  { %v3326_v29 = vpack.c.bf16 %v217_v27, %v214_v23 }
 0x162   :  { %2554 = vmatprep.mubr.bf16.mxu0 %v3326_v29 }
 0x163   :  { %2555 = vmatmul.mubr.bf16.vlgmr.msra.gmra.mrb[12].mxu0 %v3324_v28 }
 0x172   :  { %v2370_v30 = vpop.f32.mrb[0].mxu1 }
 0x173   :  { %v2371_v31 = vpop.f32.mrb[1].mxu1 }
 0x174   :  { %v2372_v32 = vadd.f32 %v2371_v31, %v2370_v30  ;;  %v2373_v33 = vpop.f32.mrb[2].mxu1 }
 0x175   :  { %v2374_v34 = vpop.f32.mrb[3].mxu1 }
 0x176   :  { %v2375_v35 = vadd.f32 %v2374_v34, %v2373_v33  ;;  %v723_v40 = vadd.f32 %v2372_v32, %v336_v36 }
 0x178   :  { %v726_v44 = vadd.f32 %v2375_v35, %v337_v38  ;;  %v2842_v38 = vld [vmem:[%s3625_s8 + $0x10] sm:$0xff]  }
 0x179   :  { %2562 = vmatprep.mubr.msk.bf16.mxu0 %vm172_vm0, %v2842_v38 }
 0x17a   :  { %v2398_v37 = vpop.f32.mrb[4].mxu0  ;;  %v2376_v48 = vpop.f32.mrb[4].mxu1 }
 0x17b   :  { %v2399_v39 = vpop.f32.mrb[5].mxu0  ;;  %v2377_v50 = vpop.f32.mrb[5].mxu1 }
 0x17c   :  { %v2400_v41 = vadd.f32 %v2399_v39, %v2398_v37  ;;  %v2401_v42 = vpop.f32.mrb[6].mxu0  ;;  %v2378_v51 = vadd.f32 %v2377_v50, %v2376_v48  ;;  %v2379_v52 = vpop.f32.mrb[6].mxu1  ;;  %v1093_v39 = vld [vmem:[%s3626_s9] sm:$0xff]  ;;  %v2282_v48 = vld [vmem:[%s3626_s9 + $0x70] sm:$0xff] }
 0x17d   :  { %v2402_v43 = vpop.f32.mrb[7].mxu0  ;;  %v2380_v55 = vpop.f32.mrb[7].mxu1 }
 0x17e   :  { %v772_v45 = vadd.f32 %v2400_v41, %v723_v40  ;;  %v2403_v46 = vadd.f32 %v2402_v43, %v2401_v42  ;;  %v731_v56 = vadd.f32 %v2378_v51, %v338_v49  ;;  %v2381_v57 = vadd.f32 %v2380_v55, %v2379_v52  ;;  %v1096_v40 = vld [vmem:[%s3626_s9 + $0x18] sm:$0xff]  ;;  %v1095_v41 = vld [vmem:[%s3626_s9 + $0x10] sm:$0xff]  ;;  %v2260_v42 = vld [vmem:[%s3626_s9 + $0x40] sm:$0xff] }
 0x17f   :  { %v2261_v43 = vld [vmem:[%s3626_s9 + $0x48] sm:$0xff]  ;;  %v2283_v49 = vld [vmem:[%s3626_s9 + $0x78] sm:$0xff] }
 0x180   :  { %v775_v47 = vadd.f32 %v2403_v46, %v726_v44  ;;  %v734_v63 = vadd.f32 %v2381_v57, %v339_v54  ;;  %v2280_v44 = vld [vmem:[%s3626_s9 + $0x60] sm:$0xff]  ;;  %v2262_v46 = vld [vmem:[%s3626_s9 + $0x50] sm:$0xff] }
 0x181   :  { %v2846_v57 = vld [vmem:[%s3625_s8 + $0x30] sm:$0xff]  }
 0x182   :  { %v2404_v53 = vpop.f32.mrb[8].mxu0 }
 0x183   :  { %v2405_v58 = vpop.f32.mrb[9].mxu0 }
 0x184   :  { %v2406_v59 = vadd.f32 %v2405_v58, %v2404_v53  ;;  %v2407_v62 = vpop.f32.mrb[10].mxu0  ;;  %v2847_v58 = vld [vmem:[%s3625_s8 + $0x38] sm:$0xff]  }
 0x185   :  { %v2408_v1 = vpop.f32.mrb[11].mxu0 }
 0x186   :  { %v780_v4 = vadd.f32 %v2406_v59, %v731_v56  ;;  %v2409_v16 = vadd.f32 %v2408_v1, %v2407_v62  ;;  %v2845_v56 = vld [vmem:[%s3625_s8 + $0x8] sm:$0xff]   ;;  %v2848_v59 = vld [vmem:[%s3625_s8 + $0x20] sm:$0xff]  }
 0x188   :  { %v783_v17 = vadd.f32 %v2409_v16, %v734_v63 }
 0x192   :  { %v2426_v18 = vpop.f32.mrb[8].mxu1 }
 0x193   :  { %v2427_v19 = vpop.f32.mrb[9].mxu1 }
 0x194   :  { %v2428_v20 = vadd.f32 %v2427_v19, %v2426_v18  ;;  %v2429_v21 = vpop.f32.mrb[10].mxu1 }
 0x195   :  { %v2430_v22 = vpop.f32.mrb[11].mxu1 }
 0x196   :  { %v821_v23 = vadd.f32 %v2428_v20, %v772_v45  ;;  %v2431_v24 = vadd.f32 %v2430_v22, %v2429_v21  ;;  %v2281_v45 = vld [vmem:[%s3626_s9 + $0x68] sm:$0xff] }
 0x198   :  { %v824_v25 = vadd.f32 %v2431_v24, %v775_v47  ;;  %v2263_v47 = vld [vmem:[%s3626_s9 + $0x58] sm:$0xff] }
 0x19a   :  { %v2432_v26 = vpop.f32.mrb[12].mxu1  ;;  %v837_v27 = vpack.c.bf16 %v824_v25, %v821_v23 }
 0x19b   :  { %v2433_v30 = vpop.f32.mrb[13].mxu1 }
 0x19c   :  { %v2434_v31 = vadd.f32 %v2433_v30, %v2432_v26  ;;  %v2435_v32 = vpop.f32.mrb[14].mxu1  ;;  %2558 = vmatprep.subr.bf16.mxu0 %v837_v27  ;;  %2590 = vmatprep.mubr.bf16.mxu1 %v837_v27 }
 0x19d   :  { %v2436_v33 = vpop.f32.mrb[15].mxu1  ;;  %2559 = vmatpush3.bf16.msra.mxu0 %v837_v27 }
 0x19e   :  { %v829_v34 = vadd.f32 %v2434_v31, %v780_v4  ;;  %v2437_v35 = vadd.f32 %v2436_v33, %v2435_v32 }
 0x1a0   :  { %v832_v36 = vadd.f32 %v2437_v35, %v783_v17 }
 0x1a2   :  { %v838_v37 = vpack.c.bf16 %v832_v36, %v829_v34 }
 0x1a4   :  { %2560 = vmatprep.subr.bf16.mxu0 %v838_v37  ;;  %2591 = vmatmul.mubr.bf16.vlgmr.msra.gmra.mrb[16].mxu1 %v838_v37 }
 0x1a5   :  { %2561 = vmatpush3.bf16.msra.mxu0 %v838_v37  ;;  %2611 = vmatpush3.bf16.msra.mxu1 %v3247_v60  ;;  %v2843_v60 = vld [vmem:[%s3625_s8 + $0x18] sm:$0xff]  }
 0x1a6   :  { %2612 = vmatprep.subr.bf16.mxu1 %v3249_v61 }
 0x1a8   :  { %2563 = vmatmul.mubr.msk.bf16.vlgmr.msra.gmra.mrb[16].mxu0 %vm172_vm0, %v2843_v60 }
 0x1a9   :  { %2613 = vmatpush3.bf16.msra.mxu1 %v3249_v61  ;;  %v2844_v61 = vld [vmem:[%s3625_s8] sm:$0xff]  }
 0x1aa   :  { %2614 = vmatprep.subr.bf16.mxu1 %v3254_v0  ;;  %2570 = vmatprep.mubr.msk.bf16.mxu0 %vm172_vm0, %v2844_v61 }
 0x1ad   :  { %2615 = vmatpush3.bf16.msra.mxu1 %v3254_v0  ;;  %v2242_v0 = vld [vmem:[%s3626_s9 + $0x30] sm:$0xff] }
 0x1ae   :  { %2616 = vmatprep.subr.bf16.mxu1 %v3256_v2 }
 0x1b1   :  { %2617 = vmatpush3.bf16.msra.mxu1 %v3256_v2  ;;  %v2240_v2 = vld [vmem:[%s3626_s9 + $0x20] sm:$0xff] }
 0x1b2   :  { %2618 = vmatprep.subr.bf16.mxu1 %v3260_v3 }
 0x1b5   :  { %2619 = vmatpush3.bf16.msra.mxu1 %v3260_v3  ;;  %v3057_v3 = vmov 0  }
 0x1b6   :  { %2620 = vmatprep.subr.bf16.mxu1 %v3264_v5  ;;  %2755 = vset.pattern.permute.xlu1 %v3057_v3 }
 0x1b7   :  { %2754 = vset.pattern.permute.xlu0 %v3057_v3  ;;  %1399 = vperm.xlu1 %2755, %v2242_v0  }
 0x1b8   :  { %1389 = vperm.xlu0 %2754, %v2240_v2  }
 0x1b9   :  { %2621 = vmatpush3.bf16.msra.mxu1 %v3264_v5  ;;  %v2243_v5 = vld [vmem:[%s3626_s9 + $0x38] sm:$0xff] }
 0x1ba   :  { %2622 = vmatprep.subr.bf16.mxu1 %v3271_v6 }
 0x1bb   :  { %1404 = vperm.xlu1 %2755, %v2243_v5  }
 0x1bd   :  { %2623 = vmatpush3.bf16.msra.mxu1 %v3271_v6  ;;  %v2241_v6 = vld [vmem:[%s3626_s9 + $0x28] sm:$0xff] }
 0x1be   :  { %2624 = vmatprep.subr.bf16.mxu1 %v3275_v7  ;;  %1394 = vperm.xlu0 %2754, %v2241_v6  }
 0x1c1   :  { %2625 = vmatpush3.bf16.msra.mxu1 %v3275_v7  ;;  %v1094_v7 = vld [vmem:[%s3626_s9 + $0x8] sm:$0xff] }
 0x1c2   :  { %1104 = vperm.xlu1 %2755, %v1094_v7   ;;  %1099 = vperm.xlu0 %2754, %v1093_v39  }
 0x1c6   :  { %1114 = vperm.xlu1 %2755, %v1096_v40   ;;  %1109 = vperm.xlu0 %2754, %v1095_v41  }
 0x1ca   :  { %1615 = vperm.xlu0 %2754, %v2260_v42   ;;  %1620 = vperm.xlu1 %2755, %v2261_v43  }
 0x1ce   :  { %1837 = vperm.xlu0 %2754, %v2280_v44   ;;  %1842 = vperm.xlu1 %2755, %v2281_v45  }
 0x1d2   :  { %1625 = vperm.xlu0 %2754, %v2262_v46   ;;  %1630 = vperm.xlu1 %2755, %v2263_v47   ;;  %v2850_v47 = vld [vmem:[%s3625_s8 + $0x50] sm:$0xff]  }
 0x1d6   :  { %1847 = vperm.xlu0 %2754, %v2282_v48   ;;  %1852 = vperm.xlu1 %2755, %v2283_v49   ;;  %v2851_v48 = vld [vmem:[%s3625_s8 + $0x58] sm:$0xff]   ;;  %v2852_v49 = vld [vmem:[%s3625_s8 + $0x40] sm:$0xff]  }
 0x236   :  { %v2556_v50 = vpop.f32.mrb[12].mxu0  ;;  %v1400_v18 = vpop.permute.xlu1 %1399 }
 0x237   :  { %v937_v51 = vpop.f32.mrb[13].mxu0  ;;  %v1390_v17 = vpop.permute.xlu0 %1389 }
 0x238   :  { %v2557_v52 = vpop.f32.mrb[14].mxu0 }
 0x239   :  { %v957_v53 = vpack.c.bf16 %v2557_v52, %v2556_v50  ;;  %v940_v54 = vpop.f32.mrb[15].mxu0 }
 0x23a   :  { %v956_v55 = vpack.c.bf16 %v940_v54, %v937_v51  ;;  %v1405_v20 = vpop.permute.xlu1 %1404 }
 0x23c   :  { %2566 = vmatprep.subr.bf16.mxu0 %v956_v55 }
 0x23d   :  { %2567 = vmatpush3.bf16.msra.mxu0 %v956_v55  ;;  %v1395_v19 = vpop.permute.xlu0 %1394 }
 0x23e   :  { %2568 = vmatprep.subr.bf16.mxu0 %v957_v53 }
 0x241   :  { %2569 = vmatpush3.bf16.msra.mxu0 %v957_v53  ;;  %v1100_v21 = vpop.permute.xlu0 %1099  ;;  %v1105_v22 = vpop.permute.xlu1 %1104 }
 0x242   :  { %2594 = vmatprep.subr.bf16.mxu0 %v3326_v29 }
 0x244   :  { %2571 = vmatmul.mubr.msk.bf16.vlgmr.msra.gmra.mrb[16].mxu0 %vm172_vm0, %v2845_v56  ;;  %v2853_v56 = vld [vmem:[%s3625_s8 + $0x48] sm:$0xff]  }
 0x245   :  { %2595 = vmatpush3.bf16.msra.mxu0 %v3326_v29  ;;  %2598 = vmatprep.mubr.msk.bf16.mxu0 %vm172_vm0, %v2846_v57  ;;  %v1110_v23 = vpop.permute.xlu0 %1109  ;;  %v1115_v25 = vpop.permute.xlu1 %1114  ;;  %v1861_v57 = vlaneseq }
 0x246   :  { %2596 = vmatprep.subr.bf16.mxu0 %v3324_v28 }
 0x249   :  { %2597 = vmatpush3.bf16.msra.mxu0 %v3324_v28  ;;  %v2849_v28 = vld [vmem:[%s3625_s8 + $0x28] sm:$0xff]  }
 0x24c   :  { %2599 = vmatmul.mubr.msk.bf16.vlgmr.msra.gmra.mrb[20].mxu0 %vm172_vm0, %v2847_v58  ;;  %v3458_v58 = vshrl.u32 %v1861_v57, 7 }
 0x24d   :  { %2606 = vmatprep.mubr.msk.bf16.mxu0 %vm172_vm0, %v2848_v59  ;;  %v3058_v59 = vmov 1.0|1.0  }
 0x277   :  { %v2592_v62 = vpop.f32.mrb[16].mxu1 }
 0x278   :  { %v1225_v29 = vpop.f32.mrb[17].mxu1 }
 0x279   :  { %v2593_v63 = vpop.f32.mrb[18].mxu1 }
 0x27a   :  { %v1246_v1 = vpack.c.bf16 %v2593_v63, %v2592_v62  ;;  %v1228_v4 = vpop.f32.mrb[19].mxu1  ;;  %v3497_v62 = vadd.s32 56, %v3458_v58  ;;  %v3514_v63 = vadd.s32 80, %v3458_v58 }
 0x27b   :  { %v1245_v16 = vpack.c.bf16 %v1228_v4, %v1225_v29  ;;  %v3507_v29 = vadd.s32 72, %v3458_v58  ;;  %v3529_v4 = vadd.s32 96, %v3458_v58 }
 0x27d   :  { %2602 = vmatprep.subr.bf16.mxu0 %v1245_v16 }
 0x27e   :  { %2603 = vmatpush3.bf16.msra.mxu0 %v1245_v16  ;;  %v3532_v16 = vadd.s32 104, %v3458_v58 }
 0x27f   :  { %2604 = vmatprep.subr.bf16.mxu0 %v1246_v1 }
 0x282   :  { %2605 = vmatpush3.bf16.msra.mxu0 %v1246_v1  ;;  %v3517_v1 = vadd.s32 88, %v3458_v58 }
 0x285   :  { %2607 = vmatmul.mubr.msk.bf16.vlgmr.msra.gmra.mrb[20].mxu0 %vm172_vm0, %v2849_v28  ;;  %v3538_v28 = vadd.s32 112, %v3458_v58 }
 0x286   :  { %2634 = vmatprep.mubr.msk.bf16.mxu0 %vm172_vm0, %v2850_v47 }
 0x317   :  { %v2572_v24 = vpop.f32.mrb[16].mxu0 }
 0x318   :  { %v1078_v26 = vpop.f32.mrb[17].mxu0  ;;  %v1119_v27 = vadd.f32 %v2572_v24, %v1110_v23 }
 0x319   :  { %v2573_v30 = vpop.f32.mrb[18].mxu0  ;;  %v1117_v31 = vadd.f32 %v1100_v21, %v1078_v26  ;;  %v1616_v21 = vpop.permute.xlu0 %1615 }
 0x31a   :  { %v1081_v32 = vpop.f32.mrb[19].mxu0  ;;  %v1120_v33 = vadd.f32 %v2573_v30, %v1115_v25  ;;  %v1123_v34 = vmax.f32 %v1119_v27, 0.0 }
 0x31b   :  { %v1121_v35 = vmax.f32 %v1117_v31, 0.0  ;;  %v1118_v36 = vadd.f32 %v1105_v22, %v1081_v32  ;;  %v1621_v22 = vpop.permute.xlu1 %1620 }
 0x31c   :  { %v1124_v37 = vmax.f32 %v1120_v33, 0.0 }
 0x31d   :  { %v1122_v38 = vmax.f32 %v1118_v36, 0.0  ;;  %v3560_v23 = vpop.permute.xlu0 %1837 }
 0x31e   :  { %v3429_v60 = vpack.c.bf16 %v1124_v37, %v1123_v34 }
 0x31f   :  { %v1125_v61 = vpack.c.bf16 %v1122_v38, %v1121_v35  ;;  %v3562_v24 = vpop.permute.xlu1 %1842 }
 0x321   :  { %2630 = vmatprep.subr.bf16.mxu0 %v1125_v61  ;;  %v1626_v26 = vpop.permute.xlu0 %1625 }
 0x322   :  { %2631 = vmatpush3.bf16.msra.mxu0 %v1125_v61 }
 0x323   :  { %2632 = vmatprep.subr.bf16.mxu0 %v3429_v60  ;;  %v1631_v30 = vpop.permute.xlu1 %1630 }
 0x326   :  { %2633 = vmatpush3.bf16.msra.mxu0 %v3429_v60 }
 0x329   :  { %2635 = vmatmul.mubr.msk.bf16.vlgmr.msra.gmra.mrb[24].mxu0 %vm172_vm0, %v2851_v48 }
 0x32a   :  { %2642 = vmatprep.mubr.msk.bf16.mxu0 %vm172_vm0, %v2852_v49 }
 0x358   :  { %v2608_v0 = vpop.f32.mrb[20].mxu0 }
 0x359   :  { %v1409_v2 = vadd.f32 %v2608_v0, %v1400_v18  ;;  %v1367_v3 = vpop.f32.mrb[21].mxu0  ;;  %v2854_v18 = vld [vmem:[%s3625_s8 + $0x70] sm:$0xff]  }
 0x35a   :  { %v1407_v5 = vadd.f32 %v1390_v17, %v1367_v3  ;;  %v2609_v6 = vpop.f32.mrb[22].mxu0  ;;  %v3541_v17 = vadd.s32 120, %v3458_v58 }
 0x35b   :  { %v1410_v7 = vadd.f32 %v2609_v6, %v1405_v20  ;;  %v1370_v39 = vpop.f32.mrb[23].mxu0  ;;  %v1413_v41 = vmax.f32 %v1409_v2, 0.0  ;;  %v2856_v20 = vld [vmem:[%s3625_s8 + $0x60] sm:$0xff]   ;;  %v2857_v6 = vld [vmem:[%s3625_s8 + $0x68] sm:$0xff]  }
 0x35c   :  { %v1408_v40 = vadd.f32 %v1395_v19, %v1370_v39  ;;  %v1411_v43 = vmax.f32 %v1407_v5, 0.0  ;;  %v2855_v19 = vld [vmem:[%s3625_s8 + $0x78] sm:$0xff]   ;;  %s3059_s8 = smov [#allocation14]  }
 0x35d   :  { %v1414_v42 = vmax.f32 %v1410_v7, 0.0  ;;  %v2284_v7 = vld [vmem:[%s3627_s10] ss:$0 sm:$0xff]  ;;  %s2118_s10 = sshll.u32 %s3059_s8, 4  ;;  %s2119_s10 = int_to_ptr.vmem [resolvable:$true] %s2118_s10 }
 0x35e   :  { %v1412_v44 = vmax.f32 %v1408_v40, 0.0  ;;  %s3012_s13 = scalar_lea.vmem %s2119_s10, 16  ;;  %s3016_s17 = scalar_lea.vmem %s2119_s10, 32 }
 0x35f   :  { %v1416_v45 = vpack.c.bf16 %v1414_v42, %v1413_v41  ;;  %p3013_p0 = scmp.ne.s32.totalorder %s2119_s10, %s3012_s13  ;;  %p3017_p1 = scmp.lt.s32.totalorder %s2119_s10, %s2119_s10 }
 0x360   :  { %v1415_v46 = vpack.c.bf16 %v1412_v44, %v1411_v43  ;;  %v1848_v44 = vpop.permute.xlu0 %1847  ;;  %p3018_p2 = scmp.lt.s32.totalorder %s3016_s17, %s3012_s13 }
 0x362   :  { %2626 = vmatprep.mubr.bf16.mxu1 %v1415_v46  ;;  %2666 = vmatprep.subr.bf16.mxu1 %v1415_v46  ;;  %p3019_p3 = por %p3018_p2, %p3017_p1 }
 0x363   :  { %2627 = vmatmul.mubr.bf16.vlgmr.msra.gmra.mrb[20].mxu1 %v1416_v45 }
 0x364   :  { %2667 = vmatpush3.bf16.msra.mxu1 %v1415_v46  ;;  %2670 = vmatprep.mubr.msk.bf16.mxu1 %vm172_vm0, %v2854_v18  ;;  %v1853_v46 = vpop.permute.xlu1 %1852  ;;  %p3020_p4 = pnand %p3019_p3, %p3013_p0 }
 0x365   :  { %2668 = vmatprep.subr.bf16.mxu1 %v1416_v45 }
 0x368   :  { %2669 = vmatpush3.bf16.msra.mxu1 %v1416_v45 }
 0x36b   :  { %2671 = vmatmul.mubr.msk.bf16.vlgmr.msra.gmra.mrb[24].mxu1 %vm172_vm0, %v2855_v19 }
 0x36c   :  { %2678 = vmatprep.mubr.msk.bf16.mxu1 %vm172_vm0, %v2856_v20 }
 0x436   :  { %v2628_v50 = vpop.f32.mrb[20].mxu1 }
 0x437   :  { %v1451_v51 = vpop.f32.mrb[21].mxu1 }
 0x438   :  { %v2629_v52 = vpop.f32.mrb[22].mxu1 }
 0x439   :  { %v1472_v53 = vpack.c.bf16 %v2629_v52, %v2628_v50  ;;  %v1454_v54 = vpop.f32.mrb[23].mxu1 }
 0x43a   :  { %v1471_v55 = vpack.c.bf16 %v1454_v54, %v1451_v51 }
 0x43c   :  { %2638 = vmatprep.subr.bf16.mxu0 %v1471_v55 }
 0x43d   :  { %2639 = vmatpush3.bf16.msra.mxu0 %v1471_v55 }
 0x43e   :  { %2640 = vmatprep.subr.bf16.mxu0 %v1472_v53 }
 0x441   :  { %2641 = vmatpush3.bf16.msra.mxu0 %v1472_v53 }
 0x442   :  { %2646 = vmatprep.subr.bf16.mxu0 %v3279_v8 }
 0x444   :  { %2643 = vmatmul.mubr.msk.bf16.vlgmr.msra.gmra.mrb[24].mxu0 %vm172_vm0, %v2853_v56 }
 0x445   :  { %2647 = vmatpush3.bf16.msra.mxu0 %v3279_v8  ;;  %2662 = vmatprep.mubr.bf16.mxu0 %v1125_v61  ;;  %v3463_v8 = vadd.s32 8, %v3458_v58 }
 0x446   :  { %2648 = vmatprep.subr.bf16.mxu0 %v3283_v9 }
 0x449   :  { %2649 = vmatpush3.bf16.msra.mxu0 %v3283_v9  ;;  %v2301_v9 = vld [vmem:[%s3628_s11] ss:$0 sm:$0xff] }
 0x44a   :  { %2650 = vmatprep.subr.bf16.mxu0 %v3287_v10  ;;  %vm1944_vm1 = vcmp.eq.s32.totalorder %v3458_v58, %v2301_v9  ;;  %vm1945_vm2 = vcmp.eq.s32.totalorder %v3463_v8, %v2301_v9  ;;  %vm1951_vm11 = vcmp.eq.s32.totalorder %v3497_v62, %v2301_v9  ;;  %vm1953_vm14 = vcmp.eq.s32.totalorder %v3507_v29, %v2301_v9 }
 0x44b   :  { %vm2334_vm3 = vmpackc.low %vm1945_vm2, %vm1944_vm1  ;;  %vm1954_vm1 = vcmp.eq.s32.totalorder %v3514_v63, %v2301_v9  ;;  %vm1955_vm2 = vcmp.eq.s32.totalorder %v3517_v1, %v2301_v9 }
 0x44d   :  { %2651 = vmatpush3.bf16.msra.mxu0 %v3287_v10  ;;  %v3473_v10 = vadd.s32 16, %v3458_v58 }
 0x44e   :  { %2652 = vmatprep.subr.bf16.mxu0 %v3289_v11 }
 0x44f   :  { %vm1946_vm4 = vcmp.eq.s32.totalorder %v3473_v10, %v2301_v9 }
 0x451   :  { %2653 = vmatpush3.bf16.msra.mxu0 %v3289_v11  ;;  %v3476_v11 = vadd.s32 24, %v3458_v58 }
 0x452   :  { %2654 = vmatprep.subr.bf16.mxu0 %v3295_v12 }
 0x453   :  { %vm1947_vm5 = vcmp.eq.s32.totalorder %v3476_v11, %v2301_v9 }
 0x454   :  { %vm2336_vm6 = vmpackc.low %vm1947_vm5, %vm1946_vm4  ;;  %vm1956_vm4 = vcmp.eq.s32.totalorder %v3529_v4, %v2301_v9  ;;  %vm1957_vm5 = vcmp.eq.s32.totalorder %v3532_v16, %v2301_v9 }
 0x455   :  { %2655 = vmatpush3.bf16.msra.mxu0 %v3295_v12  ;;  %v3483_v12 = vadd.s32 32, %v3458_v58 }
 0x456   :  { %2656 = vmatprep.subr.bf16.mxu0 %v3299_v13 }
 0x457   :  { %vm1948_vm7 = vcmp.eq.s32.totalorder %v3483_v12, %v2301_v9 }
 0x459   :  { %2657 = vmatpush3.bf16.msra.mxu0 %v3299_v13  ;;  %v3486_v13 = vadd.s32 40, %v3458_v58 }
 0x45a   :  { %2658 = vmatprep.subr.bf16.mxu0 %v3303_v14 }
 0x45b   :  { %vm1949_vm8 = vcmp.eq.s32.totalorder %v3486_v13, %v2301_v9 }
 0x45c   :  { %vm2338_vm9 = vmpackc.low %vm1949_vm8, %vm1948_vm7  ;;  %vm1958_vm7 = vcmp.eq.s32.totalorder %v3538_v28, %v2301_v9  ;;  %vm1959_vm8 = vcmp.eq.s32.totalorder %v3541_v17, %v2301_v9 }
 0x45d   :  { %2659 = vmatpush3.bf16.msra.mxu0 %v3303_v14  ;;  %v3494_v14 = vadd.s32 48, %v3458_v58 }
 0x45e   :  { %2660 = vmatprep.subr.bf16.mxu0 %v3307_v15 }
 0x45f   :  { %vm1950_vm10 = vcmp.eq.s32.totalorder %v3494_v14, %v2301_v9 }
 0x460   :  { %vm2340_vm12 = vmpackc.low %vm1951_vm11, %vm1950_vm10  ;;  %vm1883_vm10 = vcmp.eq.s32.totalorder %v3458_v58, %v2284_v7  ;;  %vm1884_vm11 = vcmp.eq.s32.totalorder %v3463_v8, %v2284_v7 }
 0x461   :  { %2661 = vmatpush3.bf16.msra.mxu0 %v3307_v15  ;;  %v3504_v15 = vadd.s32 64, %v3458_v58 }
 0x462   :  { %2702 = vmatprep.subr.msk.bf16.mxu0 %vm2334_vm3, %v3058_v59 }
 0x463   :  { %vm1952_vm13 = vcmp.eq.s32.totalorder %v3504_v15, %v2301_v9 }
 0x464   :  { %2663 = vmatmul.mubr.bf16.vlgmr.msra.gmra.mrb[28].mxu0 %v3429_v60  ;;  %vm2342_vm15 = vmpackc.low %vm1953_vm14, %vm1952_vm13  ;;  %vm1886_vm13 = vcmp.eq.s32.totalorder %v3476_v11, %v2284_v7 }
 0x465   :  { %2703 = vmatpush3.bf16.msk.msra.mxu0 %vm2334_vm3, %v3058_v59  ;;  %vm2344_vm3 = vmpackc.low %vm1955_vm2, %vm1954_vm1  ;;  %vm1887_vm1 = vcmp.eq.s32.totalorder %v3483_v12, %v2284_v7 }
 0x466   :  { %2704 = vmatprep.subr.msk.bf16.mxu0 %vm2336_vm6, %v3058_v59  ;;  %vm2318_vm14 = vmpackc.low %vm1884_vm11, %vm1883_vm10  ;;  %vm1894_vm10 = vcmp.eq.s32.totalorder %v3517_v1, %v2284_v7 }
 0x469   :  { %2705 = vmatpush3.bf16.msk.msra.mxu0 %vm2336_vm6, %v3058_v59  ;;  %vm2346_vm6 = vmpackc.low %vm1957_vm5, %vm1956_vm4  ;;  %vm1890_vm4 = vcmp.eq.s32.totalorder %v3497_v62, %v2284_v7 }
 0x46a   :  { %2706 = vmatprep.subr.msk.bf16.mxu0 %vm2338_vm9, %v3058_v59 }
 0x46d   :  { %2707 = vmatpush3.bf16.msk.msra.mxu0 %vm2338_vm9, %v3058_v59  ;;  %vm2348_vm9 = vmpackc.low %vm1959_vm8, %vm1958_vm7  ;;  %vm1892_vm7 = vcmp.eq.s32.totalorder %v3507_v29, %v2284_v7 }
 0x46e   :  { %2708 = vmatprep.subr.msk.bf16.mxu0 %vm2340_vm12, %v3058_v59 }
 0x471   :  { %2709 = vmatpush3.bf16.msk.msra.mxu0 %vm2340_vm12, %v3058_v59  ;;  %vm1885_vm12 = vcmp.eq.s32.totalorder %v3473_v10, %v2284_v7 }
 0x472   :  { %2710 = vmatprep.subr.msk.bf16.mxu0 %vm2342_vm15, %v3058_v59 }
 0x475   :  { %2711 = vmatpush3.bf16.msk.msra.mxu0 %vm2342_vm15, %v3058_v59  ;;  %vm2320_vm15 = vmpackc.low %vm1886_vm13, %vm1885_vm12  ;;  %vm1895_vm12 = vcmp.eq.s32.totalorder %v3529_v4, %v2284_v7  ;;  %vm1896_vm13 = vcmp.eq.s32.totalorder %v3532_v16, %v2284_v7 }
 0x476   :  { %2712 = vmatprep.subr.msk.bf16.mxu0 %vm2344_vm3, %v3058_v59 }
 0x479   :  { %2713 = vmatpush3.bf16.msk.msra.mxu0 %vm2344_vm3, %v3058_v59  ;;  %vm1889_vm3 = vcmp.eq.s32.totalorder %v3494_v14, %v2284_v7 }
 0x47a   :  { %2714 = vmatprep.subr.msk.bf16.mxu0 %vm2346_vm6, %v3058_v59  ;;  %vm2324_vm5 = vmpackc.low %vm1890_vm4, %vm1889_vm3 }
 0x47d   :  { %2715 = vmatpush3.bf16.msk.msra.mxu0 %vm2346_vm6, %v3058_v59  ;;  %vm1891_vm6 = vcmp.eq.s32.totalorder %v3504_v15, %v2284_v7 }
 0x47e   :  { %2716 = vmatprep.subr.msk.bf16.mxu0 %vm2348_vm9, %v3058_v59  ;;  %vm2326_vm8 = vmpackc.low %vm1892_vm7, %vm1891_vm6 }
 0x481   :  { %2717 = vmatpush3.bf16.msk.msra.mxu0 %vm2348_vm9, %v3058_v59  ;;  %vm1893_vm9 = vcmp.eq.s32.totalorder %v3514_v63, %v2284_v7 }
 0x482   :  { %vm2328_vm11 = vmpackc.low %vm1894_vm10, %vm1893_vm9 }
 0x517   :  { %v2644_v25 = vpop.f32.mrb[24].mxu0 }
 0x518   :  { %v1593_v27 = vpop.f32.mrb[25].mxu0  ;;  %v1635_v32 = vadd.f32 %v2644_v25, %v1626_v26 }
 0x519   :  { %v2645_v31 = vpop.f32.mrb[26].mxu0  ;;  %v1633_v35 = vadd.f32 %v1616_v21, %v1593_v27 }
 0x51a   :  { %v1636_v33 = vadd.f32 %v2645_v31, %v1631_v30  ;;  %v1596_v34 = vpop.f32.mrb[27].mxu0 }
 0x51b   :  { %v1634_v36 = vadd.f32 %v1621_v22, %v1596_v34 }
 0x51c   :  { %v1638_v37 = vpack.c.bf16 %v1636_v33, %v1635_v32 }
 0x51d   :  { %v1637_v38 = vpack.c.bf16 %v1634_v36, %v1633_v35 }
 0x51f   :  { %2718 = vmatprep.mubr.bf16.mxu0 %v1637_v38 }
 0x520   :  { %2719 = vmatmul.mubr.bf16.vlgmr.msra.gmra.mrb[32].mxu0 %v1638_v37 }
 0x537   :  { %v2664_v60 = vpop.f32.mrb[28].mxu0 }
 0x538   :  { %v1673_v61 = vpop.f32.mrb[29].mxu0 }
 0x539   :  { %v2665_v0 = vpop.f32.mrb[30].mxu0 }
 0x53a   :  { %v1694_v2 = vpack.c.bf16 %v2665_v0, %v2664_v60  ;;  %v1676_v3 = vpop.f32.mrb[31].mxu0 }
 0x53b   :  { %v1693_v5 = vpack.c.bf16 %v1676_v3, %v1673_v61 }
 0x53d   :  { %2674 = vmatprep.subr.bf16.mxu1 %v1693_v5 }
 0x53e   :  { %2675 = vmatpush3.bf16.msra.mxu1 %v1693_v5 }
 0x53f   :  { %2676 = vmatprep.subr.bf16.mxu1 %v1694_v2 }
 0x542   :  { %2677 = vmatpush3.bf16.msra.mxu1 %v1694_v2 }
 0x543   :  { %2682 = vmatprep.subr.msk.bf16.mxu1 %vm2318_vm14, %v3058_v59 }
 0x545   :  { %2679 = vmatmul.mubr.msk.bf16.vlgmr.msra.gmra.mrb[24].mxu1 %vm172_vm0, %v2857_v6  ;;  %vm1888_vm0 = vcmp.eq.s32.totalorder %v3486_v13, %v2284_v7 }
 0x546   :  { %2683 = vmatpush3.bf16.msk.msra.mxu1 %vm2318_vm14, %v3058_v59  ;;  %vm2322_vm2 = vmpackc.low %vm1888_vm0, %vm1887_vm1  ;;  %vm1898_vm1 = vcmp.eq.s32.totalorder %v3541_v17, %v2284_v7 }
 0x547   :  { %2684 = vmatprep.subr.msk.bf16.mxu1 %vm2320_vm15, %v3058_v59  ;;  %vm2330_vm14 = vmpackc.low %vm1896_vm13, %vm1895_vm12 }
 0x54a   :  { %2685 = vmatpush3.bf16.msk.msra.mxu1 %vm2320_vm15, %v3058_v59  ;;  %vm1897_vm15 = vcmp.eq.s32.totalorder %v3538_v28, %v2284_v7 }
 0x54b   :  { %2686 = vmatprep.subr.msk.bf16.mxu1 %vm2322_vm2, %v3058_v59  ;;  %vm2332_vm0 = vmpackc.low %vm1898_vm1, %vm1897_vm15 }
 0x54e   :  { %2687 = vmatpush3.bf16.msk.msra.mxu1 %vm2322_vm2, %v3058_v59 }
 0x54f   :  { %2688 = vmatprep.subr.msk.bf16.mxu1 %vm2324_vm5, %v3058_v59 }
 0x552   :  { %2689 = vmatpush3.bf16.msk.msra.mxu1 %vm2324_vm5, %v3058_v59 }
 0x553   :  { %2690 = vmatprep.subr.msk.bf16.mxu1 %vm2326_vm8, %v3058_v59 }
 0x556   :  { %2691 = vmatpush3.bf16.msk.msra.mxu1 %vm2326_vm8, %v3058_v59 }
 0x557   :  { %2692 = vmatprep.subr.msk.bf16.mxu1 %vm2328_vm11, %v3058_v59 }
 0x55a   :  { %2693 = vmatpush3.bf16.msk.msra.mxu1 %vm2328_vm11, %v3058_v59 }
 0x55b   :  { %2694 = vmatprep.subr.msk.bf16.mxu1 %vm2330_vm14, %v3058_v59 }
 0x55e   :  { %2695 = vmatpush3.bf16.msk.msra.mxu1 %vm2330_vm14, %v3058_v59 }
 0x55f   :  { %2696 = vmatprep.subr.msk.bf16.mxu1 %vm2332_vm0, %v3058_v59 }
 0x562   :  { %2697 = vmatpush3.bf16.msk.msra.mxu1 %vm2332_vm0, %v3058_v59 }
 0x5f3   :  { %v2720_v39 = vpop.f32.mrb[32].mxu0 }
 0x5f4   :  { %v2083_v40 = vpop.f32.mrb[33].mxu0 }
 0x5f5   :  { %v2721_v41 = vpop.f32.mrb[34].mxu0 }
 0x5f6   :  { %v2086_v42 = vpop.f32.mrb[35].mxu0 }
 0x618   :  { %v2680_v43 = vpop.f32.mrb[24].mxu1 }
 0x619   :  { %v1815_v45 = vpop.f32.mrb[25].mxu1  ;;  %v1857_v48 = vadd.f32 %v2680_v43, %v1848_v44 }
 0x61a   :  { %v2681_v47 = vpop.f32.mrb[26].mxu1  ;;  %v1855_v51 = vadd.f32 %v3560_v23, %v1815_v45 }
 0x61b   :  { %v1858_v49 = vadd.f32 %v2681_v47, %v1853_v46  ;;  %v1818_v50 = vpop.f32.mrb[27].mxu1 }
 0x61c   :  { %v1856_v52 = vadd.f32 %v3562_v24, %v1818_v50 }
 0x61d   :  { %v1860_v53 = vpack.c.bf16 %v1858_v49, %v1857_v48 }
 0x61e   :  { %v1859_v54 = vpack.c.bf16 %v1856_v52, %v1855_v51 }
 0x620   :  { %2698 = vmatprep.mubr.bf16.mxu1 %v1859_v54 }
 0x621   :  { %2699 = vmatmul.mubr.bf16.vlgmr.msra.gmra.mrb[28].mxu1 %v1860_v53 }
 0x6f4   :  { %v2700_v55 = vpop.f32.mrb[28].mxu1 }
 0x6f5   :  { %v2100_v56 = vmul.f32 %v2720_v39, %v2700_v55  ;;  %v2034_v57 = vpop.f32.mrb[29].mxu1 }
 0x6f6   :  { %v2098_v58 = vmul.f32 %v2083_v40, %v2034_v57  ;;  %v2701_v8 = vpop.f32.mrb[30].mxu1 }
 0x6f7   :  { %v2101_v9 = vmul.f32 %v2721_v41, %v2701_v8  ;;  %v2037_v10 = vpop.f32.mrb[31].mxu1 }
 0x6f8   :  { %v2099_v11 = vmul.f32 %v2086_v42, %v2037_v10 }
 0x6fa   :  { %v2102_v12 = vadd.f32 %v2099_v11, %v2098_v58 }
 0x6fc   :  { %v2103_v13 = vadd.f32 %v2102_v12, %v2100_v56 }
 0x6fe   :  { %v2104_v59 = vadd.f32 %v2103_v13, %v2101_v9 }
 0x700   :  { %v2105_v14 = vrot.slane %v2104_v59, 4 }
 0x702   :  { %v2106_v62 = vadd.f32 %v2105_v14, %v2104_v59 }
 0x704   :  { %v2107_v15 = vrot.slane %v2106_v62, 2 }
 0x706   :  { %v2108_v29 = vadd.f32 %v2107_v15, %v2106_v62 }
 0x708   :  { %v2109_v63 = vrot.slane %v2108_v29, 1 }
 0x70a   :  { %v2110_v1 = vadd.f32 %v2109_v63, %v2108_v29 }
 0x70c   :  { %2111 = vst [vmem:[#allocation14] sm:$0x1] %v2110_v1 }
 0x70d   :  { %3023 = shalt.err (!%p3020_p4)
}
 0x70e   :  { %s3024_s26 = scalar_lea.hbm %s3629_s12, 16 }
 0x70f   :  { %p3025_p5 = scmp.ne.s32.totalorder %s3629_s12, %s3024_s26  ;;  %p3028_p6 = scmp.lt.u32.totalorder %s3024_s26, %s3629_s12 }
 0x711   :  { %p3030_p7 = pnand %p3028_p6, %p3025_p5 }
 0x713   :  { %3033 = shalt.err (!%p3030_p7)
}
 0x714   :  { %2121 = dma.vmem_to_hbm [thread:$0]  %s2119_s10, 16, %s3629_s12, [#allocation4]  }
 0x715   :  { %3042 = dma.done.wait [#allocation4], 16  }
 0x716   :  { %3043 = vsyncadd [#allocation4], 4294967280 }
 0x717   :  { %2125 = vsyncpa [#allocation3], 1 }
 0x718   :  { %2126 = vsyncpa [#allocation6], 1 }
 0x719   :  { %2127 = vsyncpa [#allocation9], 1 }
 0x71a   :  { %2128 = vsyncpa [#allocation12], 1 }
 0x71b   :  { %2129 = vsyncpa [#allocation4], 1 }

</bundles_post_ra>
